<compile_context>
chip_gen: v7x
topology: tpu7x:2x2x1
jax: 0.10.0
libtpu: 0.0.40
codegen_flags: <defaults>
</compile_context>

<pallas_src>
import functools

import jax
import jax.numpy as jnp
from jax import lax
from jax.experimental import pallas as pl
from jax.experimental.pallas import tpu as pltpu

EPS = 1e-5
TAPS = tuple((dy, dx) for dy in range(3) for dx in range(3))


# ---------------------------------------------------------------------------
# Kernel 1: ConvTranspose2d(k=2, s=2) as a single matmul (channel-major).
#   y[(di*2+dj)*Cmid + co, p] = b[co] + sum_ci w_up[ci, co, di, dj] * x1[ci, p]
# grid = (N, pixel-tiles); pixels (last dim) are lanes -> lane-dense stores.
# ---------------------------------------------------------------------------
def _upconv_kernel(x_ref, w_ref, b_ref, o_ref):
    # x_ref: (1, Cin, TP) bf16 ; w_ref: (4*Cmid, Cin) bf16 ; b_ref: (4*Cmid, 1) f32
    y = jnp.dot(w_ref[...], x_ref[0], preferred_element_type=jnp.float32)
    o_ref[0] = (y + b_ref[...]).astype(o_ref.dtype)


# ---------------------------------------------------------------------------
# Kernels 2/3: fused 3x3 conv (+ optional input BN+ReLU) + BN partial stats.
#
# Inputs are spatially padded and flattened to (C, Pext) with
#   Wp = W + 2, Pext = (H + 3) * Wp   (1-px conv halo + 1 safety row),
# so tap (dy, dx) of the 3x3 conv is a pure lane-offset window of length
# Pv = H * Wp starting at dy*Wp + dx.  The 9 taps are staged once into a VMEM
# im2col scratch (9*C, Pv) and contracted with the (Cout, 9*C) weight in ONE
# bf16 MXU matmul.  Valid outputs sit at columns (q mod Wp) < W; junk columns
# are masked out of the BN statistics and land on the zero ring of the next
# conv's input.  The conv result is stored back in the same padded-flat layout
# (offset Wp + 1) so the next conv kernel consumes it with no glue.
# ---------------------------------------------------------------------------
def _conv_finish(col_ref, w_ref, vmask_ref, o_ref, st_ref, *, Wp, Pv):
    conv = jnp.dot(w_ref[...], col_ref[...], preferred_element_type=jnp.float32)
    cm = conv * vmask_ref[...]                       # drop junk columns from stats
    st_ref[0, :, 0:1] = jnp.sum(cm, axis=1, keepdims=True)        # per-channel sum
    st_ref[0, :, 1:2] = jnp.sum(cm * cm, axis=1, keepdims=True)   # per-channel sumsq
    o_ref[0] = jnp.zeros(o_ref.shape[1:], jnp.float32)            # pad ring
    o_ref[0, :, Wp + 1:Wp + 1 + Pv] = conv                        # valid region


def _dconv_cat_kernel(x2_ref, x1_ref, w_ref, vmask_ref, o_ref, st_ref, col_ref,
                      *, Wp):
    # First DoubleConv conv: torch.cat([x2, x1u], dim=1) done during im2col
    # staging in VMEM (split weights), never materialized in HBM.
    C2, Cm = x2_ref.shape[1], x1_ref.shape[1]
    C1 = C2 + Cm
    Pv = col_ref.shape[1]
    for t, (dy, dx) in enumerate(TAPS):
        s = dy * Wp + dx
        col_ref[t * C1:t * C1 + C2, :] = x2_ref[0, :, s:s + Pv]
        col_ref[t * C1 + C2:(t + 1) * C1, :] = x1_ref[0, :, s:s + Pv]
    _conv_finish(col_ref, w_ref, vmask_ref, o_ref, st_ref, Wp=Wp, Pv=Pv)


def _dconv_norm_kernel(h_ref, sc_ref, sh_ref, imask_ref, w_ref, vmask_ref,
                       o_ref, st_ref, act_ref, col_ref, *, Wp):
    # Second DoubleConv conv: BN1 + ReLU applied on the fly to the raw conv1
    # activations (scale/shift precomputed from the global batch stats); the
    # pad ring is re-zeroed (imask) to match zero-padding of the post-ReLU map.
    C = h_ref.shape[1]
    Pv = col_ref.shape[1]
    a = jnp.maximum(sc_ref[...] * h_ref[0] + sh_ref[...], 0.0) * imask_ref[...]
    act_ref[...] = a.astype(act_ref.dtype)           # bf16 for the MXU
    for t, (dy, dx) in enumerate(TAPS):
        s = dy * Wp + dx
        col_ref[t * C:(t + 1) * C, :] = act_ref[:, s:s + Pv]
    _conv_finish(col_ref, w_ref, vmask_ref, o_ref, st_ref, Wp=Wp, Pv=Pv)


# ---------------------------------------------------------------------------
# Kernel 4: final BN + ReLU (tiled element-wise, lane-dense pixel tiles).
# ---------------------------------------------------------------------------
def _bn_relu_kernel(h_ref, sc_ref, sh_ref, o_ref):
    o_ref[0] = jnp.maximum(sc_ref[...] * h_ref[0] + sh_ref[...], 0.0)


# ---------------------------------------------------------------------------
# Small host-side helpers (O(C) work only).
# ---------------------------------------------------------------------------
def _bn_affine(stats, gamma, beta, count):
    # stats: (N, C, 2) per-image [sum, sumsq] -> fused scale/shift, f32.
    s = jnp.sum(stats, axis=0)                       # (C, 2)
    mean = s[:, 0] / count
    var = jnp.maximum(s[:, 1] / count - mean * mean, 0.0)   # biased (training BN)
    scale = gamma * lax.rsqrt(var + EPS)
    shift = beta - mean * scale
    return (scale.reshape(-1, 1).astype(jnp.float32),
            shift.reshape(-1, 1).astype(jnp.float32))


def _pick_tile(p, cap):
    # Block last-dim must be a multiple of 128 or equal the full dim.
    return p if p <= cap else cap                    # cap is a multiple of 128


# ---------------------------------------------------------------------------
# Full Up.forward (NCHW in / NCHW out, like the PyTorch module).
# ---------------------------------------------------------------------------
def up_forward(params, x1, x2):
    x1 = x1.astype(jnp.float32)
    x2 = x2.astype(jnp.float32)
    N, Cin, H1, W1 = x1.shape
    _, C2, H, W = x2.shape
    Cmid = params["up_w"].shape[1]
    Cout = params["c1_w"].shape[0]

    par1 = pltpu.CompilerParams(dimension_semantics=("parallel",),
                                vmem_limit_bytes=32 * 1024 * 1024)
    par2 = pltpu.CompilerParams(dimension_semantics=("parallel", "parallel"))

    # ---- ConvTranspose2d(k=2, s=2) as one (4*Cmid, Cin) @ (Cin, pixels) matmul
    P1 = H1 * W1
    w_up = jnp.transpose(params["up_w"], (2, 3, 1, 0)).reshape(4 * Cmid, Cin)
    b_up = jnp.tile(params["up_b"], 4).reshape(4 * Cmid, 1).astype(jnp.float32)
    x1f = x1.reshape(N, Cin, P1).astype(jnp.bfloat16)
    tp1 = _pick_tile(P1, 512)
    y = pl.pallas_call(
        _upconv_kernel,
        out_shape=jax.ShapeDtypeStruct((N, 4 * Cmid, P1), jnp.bfloat16),
        grid=(N, pl.cdiv(P1, tp1)),
        in_specs=[pl.BlockSpec((1, Cin, tp1), lambda n, p: (n, 0, p)),
                  pl.BlockSpec((4 * Cmid, Cin), lambda n, p: (0, 0)),
                  pl.BlockSpec((4 * Cmid, 1), lambda n, p: (0, 0))],
        out_specs=pl.BlockSpec((1, 4 * Cmid, tp1), lambda n, p: (n, 0, p)),
        compiler_params=par2,
    )(x1f, w_up.astype(jnp.bfloat16), b_up)

    # Interleave the (di, dj) taps into the 2x-upsampled grid and fold the
    # F.pad alignment + the 3x3 halo pad into a single pad, then flatten the
    # spatial dims.  (Small layout glue on the smallest tensor in the block.)
    x1u = y.reshape(N, 2, 2, Cmid, H1, W1)
    x1u = jnp.transpose(x1u, (0, 3, 4, 1, 5, 2)).reshape(N, Cmid, 2 * H1, 2 * W1)
    dy_, dx_ = H - 2 * H1, W - 2 * W1                # F.pad alignment (usually 0)
    Wp = W + 2
    Pext = (H + 3) * Wp                              # halo + 1 safety row, flat
    Pv = H * Wp
    x1up = jnp.pad(
        x1u, ((0, 0), (0, 0),
              (1 + dy_ // 2, 1 + (dy_ - dy_ // 2) + 1),
              (1 + dx_ // 2, 1 + (dx_ - dx_ // 2)))).reshape(N, Cmid, Pext)
    x2p = jnp.pad(x2, ((0, 0), (0, 0), (1, 2), (1, 1))).reshape(N, C2, Pext)

    # Tiny constant masks (valid conv columns / interior of the pad ring).
    col = jnp.arange(Pext, dtype=jnp.int32) % Wp
    row = jnp.arange(Pext, dtype=jnp.int32) // Wp
    vmask = (col[:Pv] < W).astype(jnp.float32).reshape(1, Pv)
    imask = ((row >= 1) & (row <= H) & (col >= 1) & (col <= W)
             ).astype(jnp.float32).reshape(1, Pext)

    conv_outs = [jax.ShapeDtypeStruct((N, Cout, Pext), jnp.float32),
                 jax.ShapeDtypeStruct((N, Cout, 2), jnp.float32)]
    conv_out_specs = [pl.BlockSpec((1, Cout, Pext), lambda n: (n, 0, 0)),
                      pl.BlockSpec((1, Cout, 2), lambda n: (n, 0, 0))]

    # ---- conv1 (on the virtual concat of x2 and x1u) + BN1 partial stats
    C1 = C2 + Cmid
    w1 = jnp.transpose(params["c1_w"], (0, 2, 3, 1)).reshape(Cout, 9 * C1)
    h1_raw, st1 = pl.pallas_call(
        functools.partial(_dconv_cat_kernel, Wp=Wp),
        out_shape=conv_outs,
        grid=(N,),
        in_specs=[pl.BlockSpec((1, C2, Pext), lambda n: (n, 0, 0)),
                  pl.BlockSpec((1, Cmid, Pext), lambda n: (n, 0, 0)),
                  pl.BlockSpec((Cout, 9 * C1), lambda n: (0, 0)),
                  pl.BlockSpec((1, Pv), lambda n: (0, 0))],
        out_specs=conv_out_specs,
        scratch_shapes=[pltpu.VMEM((9 * C1, Pv), jnp.bfloat16)],
        compiler_params=par1,
    )(x2p.astype(jnp.bfloat16), x1up.astype(jnp.bfloat16),
      w1.astype(jnp.bfloat16), vmask)

    scale1, shift1 = _bn_affine(st1, params["bn1_g"], params["bn1_b"], N * H * W)

    # ---- conv2 (BN1+ReLU fused on the input) + BN2 partial stats
    w2 = jnp.transpose(params["c2_w"], (0, 2, 3, 1)).reshape(Cout, 9 * Cout)
    h2_raw, st2 = pl.pallas_call(
        functools.partial(_dconv_norm_kernel, Wp=Wp),
        out_shape=conv_outs,
        grid=(N,),
        in_specs=[pl.BlockSpec((1, Cout, Pext), lambda n: (n, 0, 0)),
                  pl.BlockSpec((Cout, 1), lambda n: (0, 0)),
                  pl.BlockSpec((Cout, 1), lambda n: (0, 0)),
                  pl.BlockSpec((1, Pext), lambda n: (0, 0)),
                  pl.BlockSpec((Cout, 9 * Cout), lambda n: (0, 0)),
                  pl.BlockSpec((1, Pv), lambda n: (0, 0))],
        out_specs=conv_out_specs,
        scratch_shapes=[pltpu.VMEM((Cout, Pext), jnp.bfloat16),
                        pltpu.VMEM((9 * Cout, Pv), jnp.bfloat16)],
        compiler_params=par1,
    )(h1_raw, scale1, shift1, imask, w2.astype(jnp.bfloat16), vmask)

    scale2, shift2 = _bn_affine(st2, params["bn2_g"], params["bn2_b"], N * H * W)

    # ---- final BN2 + ReLU, tiled over pixels (lane-dense)
    tpe = _pick_tile(Pext, 1024)
    out_p = pl.pallas_call(
        _bn_relu_kernel,
        out_shape=jax.ShapeDtypeStruct((N, Cout, Pext), jnp.float32),
        grid=(N, pl.cdiv(Pext, tpe)),
        in_specs=[pl.BlockSpec((1, Cout, tpe), lambda n, p: (n, 0, p)),
                  pl.BlockSpec((Cout, 1), lambda n, p: (0, 0)),
                  pl.BlockSpec((Cout, 1), lambda n, p: (0, 0))],
        out_specs=pl.BlockSpec((1, Cout, tpe), lambda n, p: (n, 0, p)),
        compiler_params=par2,
    )(h2_raw, scale2, shift2)

    # Un-flatten and drop the pad ring -> NCHW output.
    return out_p.reshape(N, Cout, H + 3, Wp)[:, :, 1:H + 1, 1:W + 1]


# ---------------------------------------------------------------------------
# Pure-JAX reference (independent code path: XLA conv / einsum) for validation.
# ---------------------------------------------------------------------------
def ref_forward(params, x1, x2):
    N, Cin, H, W = x1.shape
    Cmid = params["up_w"].shape[1]
    y = jnp.einsum("nchw,cdij->ndhiwj", x1, params["up_w"])
    y = y.reshape(N, Cmid, 2 * H, 2 * W) + params["up_b"][None, :, None, None]
    diff_x = x2.shape[3] - y.shape[3]
    diff_y = x2.shape[2] - y.shape[2]
    y = jnp.pad(y, ((0, 0), (0, 0),
                    (diff_y // 2, diff_y - diff_y // 2),
                    (diff_x // 2, diff_x - diff_x // 2)))
    x = jnp.concatenate([x2, y], axis=1)

    def conv(v, w):
        return lax.conv_general_dilated(
            v, w, (1, 1), "SAME", dimension_numbers=("NCHW", "OIHW", "NCHW"))

    def bn_relu(v, g, b):
        mean = jnp.mean(v, axis=(0, 2, 3), keepdims=True)
        var = jnp.mean((v - mean) ** 2, axis=(0, 2, 3), keepdims=True)
        vh = (v - mean) / jnp.sqrt(var + EPS)
        return jnp.maximum(vh * g[None, :, None, None] + b[None, :, None, None], 0.0)

    h = bn_relu(conv(x, params["c1_w"]), params["bn1_g"], params["bn1_b"])
    h = bn_relu(conv(h, params["c2_w"]), params["bn2_g"], params["bn2_b"])
    return h


if __name__ == "__main__":
    IN_DIM, OUT_DIM = 8, 4          # Up(in_dim=8, out_dim=4, bilinear=False)
    N, H1, W1 = 2, 8, 8             # x1: (N, 8, 8, 8); x2: (N, 4, 16, 16)

    keys = jax.random.split(jax.random.PRNGKey(0), 10)
    params = {
        "up_w":  0.2 * jax.random.normal(keys[0], (IN_DIM, IN_DIM // 2, 2, 2), jnp.float32),
        "up_b":  0.1 * jax.random.normal(keys[1], (IN_DIM // 2,), jnp.float32),
        "c1_w":  0.2 * jax.random.normal(keys[2], (OUT_DIM, IN_DIM, 3, 3), jnp.float32),
        "bn1_g": 1.0 + 0.1 * jax.random.normal(keys[3], (OUT_DIM,), jnp.float32),
        "bn1_b": 0.1 * jax.random.normal(keys[4], (OUT_DIM,), jnp.float32),
        "c2_w":  0.2 * jax.random.normal(keys[5], (OUT_DIM, OUT_DIM, 3, 3), jnp.float32),
        "bn2_g": 1.0 + 0.1 * jax.random.normal(keys[6], (OUT_DIM,), jnp.float32),
        "bn2_b": 0.1 * jax.random.normal(keys[7], (OUT_DIM,), jnp.float32),
    }
    x1 = jax.random.normal(keys[8], (N, IN_DIM, H1, W1), jnp.float32)
    x2 = jax.random.normal(keys[9], (N, IN_DIM // 2, 2 * H1, 2 * W1), jnp.float32)

    # Round params/inputs to bf16-representable values so the f32 reference
    # and the bf16-MXU kernel path consume identical numbers.
    rnd = lambda t: t.astype(jnp.bfloat16).astype(jnp.float32)
    params = jax.tree.map(rnd, params)
    x1, x2 = rnd(x1), rnd(x2)

    out = jax.block_until_ready(jax.jit(up_forward)(params, x1, x2))
    ref = jax.block_until_ready(jax.jit(ref_forward)(params, x1, x2))

    assert out.shape == (N, OUT_DIM, 2 * H1, 2 * W1), out.shape
    max_err = float(jnp.max(jnp.abs(out - ref)))
    # bf16 matmul operands (f32 accumulation / BN math) -> loose-ish tolerance.
    assert max_err < 5e-2, f"mismatch vs reference: max abs err = {max_err}"

    print("KERNEL_OK")
</pallas_src>

<mosaic_0001>
module attributes {stable_mosaic.version = 11 : i64} {
  func.func @_upconv_kernel(%arg0: i32, %arg1: i32, %arg2: memref<1x8x64xbf16, #tpu.memory_space<vmem>>, %arg3: memref<16x8xbf16, #tpu.memory_space<vmem>>, %arg4: memref<16x1xf32, #tpu.memory_space<vmem>>, %arg5: memref<1x16x64xbf16, #tpu.memory_space<vmem>>) attributes {dimension_semantics = [#tpu.dimension_semantics<parallel>, #tpu.dimension_semantics<parallel>], iteration_bounds = array<i64: 2, 1>, scalar_prefetch = 0 : i64, scratch_operands = 0 : i64, tpu.core_type = #tpu.core_type<tc>, window_params = [{transform_indices = @transform_0, window_bounds = array<i64: 1, 8, 64>}, {pipeline_mode = #tpu.pipeline_mode<synchronous>, transform_indices = @transform_1, window_bounds = array<i64: 16, 8>}, {pipeline_mode = #tpu.pipeline_mode<synchronous>, transform_indices = @transform_2, window_bounds = array<i64: 16, 1>}, {transform_indices = @transform_3, window_bounds = array<i64: 1, 16, 64>}]} {
    %c0 = arith.constant 0 : index
    %c0_0 = arith.constant 0 : index
    %0 = vector.load %arg3[%c0, %c0_0] : memref<16x8xbf16, #tpu.memory_space<vmem>>, vector<16x8xbf16>
    %c0_1 = arith.constant 0 : index
    %c0_2 = arith.constant 0 : index
    %c0_3 = arith.constant 0 : index
    %1 = vector.load %arg2[%c0_1, %c0_2, %c0_3] : memref<1x8x64xbf16, #tpu.memory_space<vmem>>, vector<1x8x64xbf16>
    %2 = vector.shape_cast %1 : vector<1x8x64xbf16> to vector<8x64xbf16>
    %cst = arith.constant dense<0.000000e+00> : vector<16x64xf32>
    %3 = tpu.matmul %0, %2, %cst {dimension_numbers = #tpu.dot_dimension_numbers<[1], [0], [0], [1], [0, 0, 1, 1], [], []>} : vector<16x8xbf16>, vector<8x64xbf16>, vector<16x64xf32> -> vector<16x64xf32>
    %c0_4 = arith.constant 0 : index
    %c0_5 = arith.constant 0 : index
    %4 = vector.load %arg4[%c0_4, %c0_5] : memref<16x1xf32, #tpu.memory_space<vmem>>, vector<16x1xf32>
    %5 = vector.broadcast %4 : vector<16x1xf32> to vector<16x64xf32>
    %6 = arith.addf %3, %5 : vector<16x64xf32>
    %7 = arith.truncf %6 : vector<16x64xf32> to vector<16x64xbf16>
    %c0_6 = arith.constant 0 : index
    %c0_7 = arith.constant 0 : index
    %c0_8 = arith.constant 0 : index
    %8 = vector.load %arg5[%c0_6, %c0_7, %c0_8] : memref<1x16x64xbf16, #tpu.memory_space<vmem>>, vector<1x16x64xbf16>
    %9 = vector.shape_cast %8 : vector<1x16x64xbf16> to vector<16x64xbf16>
    %10 = vector.shape_cast %7 : vector<16x64xbf16> to vector<1x16x64xbf16>
    tpu.vector_store %arg5[%c0_6, %c0_7, %c0_8], %10 {strides = array<i32>} : memref<1x16x64xbf16, #tpu.memory_space<vmem>>, vector<1x16x64xbf16>,
    return
  }
  func.func @transform_0(%arg0: i32, %arg1: i32) -> (i32, i32, i32) {
    %c0_i32 = arith.constant 0 : i32
    %c0_i32_0 = arith.constant 0 : i32
    return %arg0, %c0_i32, %arg1 : i32, i32, i32
  }
  func.func @transform_1(%arg0: i32, %arg1: i32) -> (i32, i32) {
    %c0_i32 = arith.constant 0 : i32
    %c0_i32_0 = arith.constant 0 : i32
    %c0_i32_1 = arith.constant 0 : i32
    return %c0_i32, %c0_i32_0 : i32, i32
  }
  func.func @transform_2(%arg0: i32, %arg1: i32) -> (i32, i32) {
    %c0_i32 = arith.constant 0 : i32
    %c0_i32_0 = arith.constant 0 : i32
    %c0_i32_1 = arith.constant 0 : i32
    return %c0_i32, %c0_i32_0 : i32, i32
  }
  func.func @transform_3(%arg0: i32, %arg1: i32) -> (i32, i32, i32) {
    %c0_i32 = arith.constant 0 : i32
    %c0_i32_0 = arith.constant 0 : i32
    return %arg0, %c0_i32, %arg1 : i32, i32, i32
  }
}

module attributes {stable_mosaic.version = 11 : i64} {
  func.func @_dconv_cat_kernel(%arg0: i32, %arg1: memref<1x4x342xbf16, #tpu.memory_space<vmem>>, %arg2: memref<1x4x342xbf16, #tpu.memory_space<vmem>>, %arg3: memref<4x72xbf16, #tpu.memory_space<vmem>>, %arg4: memref<1x288xf32, #tpu.memory_space<vmem>>, %arg5: memref<1x4x342xf32, #tpu.memory_space<vmem>>, %arg6: memref<1x4x2xf32, #tpu.memory_space<vmem>>, %arg7: memref<72x288xbf16, #tpu.memory_space<vmem>>) attributes {dimension_semantics = [#tpu.dimension_semantics<parallel>], iteration_bounds = array<i64: 2>, scalar_prefetch = 0 : i64, scratch_operands = 1 : i64, tpu.core_type = #tpu.core_type<tc>, window_params = [{transform_indices = @transform_0, window_bounds = array<i64: 1, 4, 342>}, {transform_indices = @transform_1, window_bounds = array<i64: 1, 4, 342>}, {pipeline_mode = #tpu.pipeline_mode<synchronous>, transform_indices = @transform_2, window_bounds = array<i64: 4, 72>}, {pipeline_mode = #tpu.pipeline_mode<synchronous>, transform_indices = @transform_3, window_bounds = array<i64: 1, 288>}, {transform_indices = @transform_4, window_bounds = array<i64: 1, 4, 342>}, {transform_indices = @transform_5, window_bounds = array<i64: 1, 4, 2>}]} {
    %c0 = arith.constant 0 : index
    %c0_0 = arith.constant 0 : index
    %c0_1 = arith.constant 0 : index
    %0 = vector.load %arg1[%c0, %c0_0, %c0_1] : memref<1x4x342xbf16, #tpu.memory_space<vmem>>, vector<1x4x288xbf16>
    %1 = vector.shape_cast %0 : vector<1x4x288xbf16> to vector<4x288xbf16>
    %c0_2 = arith.constant 0 : index
    %c0_3 = arith.constant 0 : index
    %2 = vector.load %arg7[%c0_2, %c0_3] : memref<72x288xbf16, #tpu.memory_space<vmem>>, vector<4x288xbf16>
    tpu.vector_store %arg7[%c0_2, %c0_3], %1 {strides = array<i32>} : memref<72x288xbf16, #tpu.memory_space<vmem>>, vector<4x288xbf16>,
    %c0_4 = arith.constant 0 : index
    %c0_5 = arith.constant 0 : index
    %c0_6 = arith.constant 0 : index
    %3 = vector.load %arg2[%c0_4, %c0_5, %c0_6] : memref<1x4x342xbf16, #tpu.memory_space<vmem>>, vector<1x4x288xbf16>
    %4 = vector.shape_cast %3 : vector<1x4x288xbf16> to vector<4x288xbf16>
    %c4 = arith.constant 4 : index
    %c0_7 = arith.constant 0 : index
    %5 = vector.load %arg7[%c4, %c0_7] : memref<72x288xbf16, #tpu.memory_space<vmem>>, vector<4x288xbf16>
    tpu.vector_store %arg7[%c4, %c0_7], %4 {strides = array<i32>} : memref<72x288xbf16, #tpu.memory_space<vmem>>, vector<4x288xbf16>,
    %c0_8 = arith.constant 0 : index
    %c0_9 = arith.constant 0 : index
    %c1 = arith.constant 1 : index
    %6 = vector.load %arg1[%c0_8, %c0_9, %c1] : memref<1x4x342xbf16, #tpu.memory_space<vmem>>, vector<1x4x288xbf16>
    %7 = vector.shape_cast %6 : vector<1x4x288xbf16> to vector<4x288xbf16>
    %c8 = arith.constant 8 : index
    %c0_10 = arith.constant 0 : index
    %8 = vector.load %arg7[%c8, %c0_10] : memref<72x288xbf16, #tpu.memory_space<vmem>>, vector<4x288xbf16>
    tpu.vector_store %arg7[%c8, %c0_10], %7 {strides = array<i32>} : memref<72x288xbf16, #tpu.memory_space<vmem>>, vector<4x288xbf16>,
    %c0_11 = arith.constant 0 : index
    %c0_12 = arith.constant 0 : index
    %c1_13 = arith.constant 1 : index
    %9 = vector.load %arg2[%c0_11, %c0_12, %c1_13] : memref<1x4x342xbf16, #tpu.memory_space<vmem>>, vector<1x4x288xbf16>
    %10 = vector.shape_cast %9 : vector<1x4x288xbf16> to vector<4x288xbf16>
    %c12 = arith.constant 12 : index
    %c0_14 = arith.constant 0 : index
    %11 = vector.load %arg7[%c12, %c0_14] : memref<72x288xbf16, #tpu.memory_space<vmem>>, vector<4x288xbf16>
    tpu.vector_store %arg7[%c12, %c0_14], %10 {strides = array<i32>} : memref<72x288xbf16, #tpu.memory_space<vmem>>, vector<4x288xbf16>,
    %c0_15 = arith.constant 0 : index
    %c0_16 = arith.constant 0 : index
    %c2 = arith.constant 2 : index
    %12 = vector.load %arg1[%c0_15, %c0_16, %c2] : memref<1x4x342xbf16, #tpu.memory_space<vmem>>, vector<1x4x288xbf16>
    %13 = vector.shape_cast %12 : vector<1x4x288xbf16> to vector<4x288xbf16>
    %c16 = arith.constant 16 : index
    %c0_17 = arith.constant 0 : index
    %14 = vector.load %arg7[%c16, %c0_17] : memref<72x288xbf16, #tpu.memory_space<vmem>>, vector<4x288xbf16>
    tpu.vector_store %arg7[%c16, %c0_17], %13 {strides = array<i32>} : memref<72x288xbf16, #tpu.memory_space<vmem>>, vector<4x288xbf16>,
    %c0_18 = arith.constant 0 : index
    %c0_19 = arith.constant 0 : index
    %c2_20 = arith.constant 2 : index
    %15 = vector.load %arg2[%c0_18, %c0_19, %c2_20] : memref<1x4x342xbf16, #tpu.memory_space<vmem>>, vector<1x4x288xbf16>
    %16 = vector.shape_cast %15 : vector<1x4x288xbf16> to vector<4x288xbf16>
    %c20 = arith.constant 20 : index
    %c0_21 = arith.constant 0 : index
    %17 = vector.load %arg7[%c20, %c0_21] : memref<72x288xbf16, #tpu.memory_space<vmem>>, vector<4x288xbf16>
    tpu.vector_store %arg7[%c20, %c0_21], %16 {strides = array<i32>} : memref<72x288xbf16, #tpu.memory_space<vmem>>, vector<4x288xbf16>,
    %c0_22 = arith.constant 0 : index
    %c0_23 = arith.constant 0 : index
    %c18 = arith.constant 18 : index
    %18 = vector.load %arg1[%c0_22, %c0_23, %c18] : memref<1x4x342xbf16, #tpu.memory_space<vmem>>, vector<1x4x288xbf16>
    %19 = vector.shape_cast %18 : vector<1x4x288xbf16> to vector<4x288xbf16>
    %c24 = arith.constant 24 : index
    %c0_24 = arith.constant 0 : index
    %20 = vector.load %arg7[%c24, %c0_24] : memref<72x288xbf16, #tpu.memory_space<vmem>>, vector<4x288xbf16>
    tpu.vector_store %arg7[%c24, %c0_24], %19 {strides = array<i32>} : memref<72x288xbf16, #tpu.memory_space<vmem>>, vector<4x288xbf16>,
    %c0_25 = arith.constant 0 : index
    %c0_26 = arith.constant 0 : index
    %c18_27 = arith.constant 18 : index
    %21 = vector.load %arg2[%c0_25, %c0_26, %c18_27] : memref<1x4x342xbf16, #tpu.memory_space<vmem>>, vector<1x4x288xbf16>
    %22 = vector.shape_cast %21 : vector<1x4x288xbf16> to vector<4x288xbf16>
    %c28 = arith.constant 28 : index
    %c0_28 = arith.constant 0 : index
    %23 = vector.load %arg7[%c28, %c0_28] : memref<72x288xbf16, #tpu.memory_space<vmem>>, vector<4x288xbf16>
    tpu.vector_store %arg7[%c28, %c0_28], %22 {strides = array<i32>} : memref<72x288xbf16, #tpu.memory_space<vmem>>, vector<4x288xbf16>,
    %c0_29 = arith.constant 0 : index
    %c0_30 = arith.constant 0 : index
    %c19 = arith.constant 19 : index
    %24 = vector.load %arg1[%c0_29, %c0_30, %c19] : memref<1x4x342xbf16, #tpu.memory_space<vmem>>, vector<1x4x288xbf16>
    %25 = vector.shape_cast %24 : vector<1x4x288xbf16> to vector<4x288xbf16>
    %c32 = arith.constant 32 : index
    %c0_31 = arith.constant 0 : index
    %26 = vector.load %arg7[%c32, %c0_31] : memref<72x288xbf16, #tpu.memory_space<vmem>>, vector<4x288xbf16>
    tpu.vector_store %arg7[%c32, %c0_31], %25 {strides = array<i32>} : memref<72x288xbf16, #tpu.memory_space<vmem>>, vector<4x288xbf16>,
    %c0_32 = arith.constant 0 : index
    %c0_33 = arith.constant 0 : index
    %c19_34 = arith.constant 19 : index
    %27 = vector.load %arg2[%c0_32, %c0_33, %c19_34] : memref<1x4x342xbf16, #tpu.memory_space<vmem>>, vector<1x4x288xbf16>
    %28 = vector.shape_cast %27 : vector<1x4x288xbf16> to vector<4x288xbf16>
    %c36 = arith.constant 36 : index
    %c0_35 = arith.constant 0 : index
    %29 = vector.load %arg7[%c36, %c0_35] : memref<72x288xbf16, #tpu.memory_space<vmem>>, vector<4x288xbf16>
    tpu.vector_store %arg7[%c36, %c0_35], %28 {strides = array<i32>} : memref<72x288xbf16, #tpu.memory_space<vmem>>, vector<4x288xbf16>,
    %c0_36 = arith.constant 0 : index
    %c0_37 = arith.constant 0 : index
    %c20_38 = arith.constant 20 : index
    %30 = vector.load %arg1[%c0_36, %c0_37, %c20_38] : memref<1x4x342xbf16, #tpu.memory_space<vmem>>, vector<1x4x288xbf16>
    %31 = vector.shape_cast %30 : vector<1x4x288xbf16> to vector<4x288xbf16>
    %c40 = arith.constant 40 : index
    %c0_39 = arith.constant 0 : index
    %32 = vector.load %arg7[%c40, %c0_39] : memref<72x288xbf16, #tpu.memory_space<vmem>>, vector<4x288xbf16>
    tpu.vector_store %arg7[%c40, %c0_39], %31 {strides = array<i32>} : memref<72x288xbf16, #tpu.memory_space<vmem>>, vector<4x288xbf16>,
    %c0_40 = arith.constant 0 : index
    %c0_41 = arith.constant 0 : index
    %c20_42 = arith.constant 20 : index
    %33 = vector.load %arg2[%c0_40, %c0_41, %c20_42] : memref<1x4x342xbf16, #tpu.memory_space<vmem>>, vector<1x4x288xbf16>
    %34 = vector.shape_cast %33 : vector<1x4x288xbf16> to vector<4x288xbf16>
    %c44 = arith.constant 44 : index
    %c0_43 = arith.constant 0 : index
    %35 = vector.load %arg7[%c44, %c0_43] : memref<72x288xbf16, #tpu.memory_space<vmem>>, vector<4x288xbf16>
    tpu.vector_store %arg7[%c44, %c0_43], %34 {strides = array<i32>} : memref<72x288xbf16, #tpu.memory_space<vmem>>, vector<4x288xbf16>,
    %c0_44 = arith.constant 0 : index
    %c0_45 = arith.constant 0 : index
    %c36_46 = arith.constant 36 : index
    %36 = vector.load %arg1[%c0_44, %c0_45, %c36_46] : memref<1x4x342xbf16, #tpu.memory_space<vmem>>, vector<1x4x288xbf16>
    %37 = vector.shape_cast %36 : vector<1x4x288xbf16> to vector<4x288xbf16>
    %c48 = arith.constant 48 : index
    %c0_47 = arith.constant 0 : index
    %38 = vector.load %arg7[%c48, %c0_47] : memref<72x288xbf16, #tpu.memory_space<vmem>>, vector<4x288xbf16>
    tpu.vector_store %arg7[%c48, %c0_47], %37 {strides = array<i32>} : memref<72x288xbf16, #tpu.memory_space<vmem>>, vector<4x288xbf16>,
    %c0_48 = arith.constant 0 : index
    %c0_49 = arith.constant 0 : index
    %c36_50 = arith.constant 36 : index
    %39 = vector.load %arg2[%c0_48, %c0_49, %c36_50] : memref<1x4x342xbf16, #tpu.memory_space<vmem>>, vector<1x4x288xbf16>
    %40 = vector.shape_cast %39 : vector<1x4x288xbf16> to vector<4x288xbf16>
    %c52 = arith.constant 52 : index
    %c0_51 = arith.constant 0 : index
    %41 = vector.load %arg7[%c52, %c0_51] : memref<72x288xbf16, #tpu.memory_space<vmem>>, vector<4x288xbf16>
    tpu.vector_store %arg7[%c52, %c0_51], %40 {strides = array<i32>} : memref<72x288xbf16, #tpu.memory_space<vmem>>, vector<4x288xbf16>,
    %c0_52 = arith.constant 0 : index
    %c0_53 = arith.constant 0 : index
    %c37 = arith.constant 37 : index
    %42 = vector.load %arg1[%c0_52, %c0_53, %c37] : memref<1x4x342xbf16, #tpu.memory_space<vmem>>, vector<1x4x288xbf16>
    %43 = vector.shape_cast %42 : vector<1x4x288xbf16> to vector<4x288xbf16>
    %c56 = arith.constant 56 : index
    %c0_54 = arith.constant 0 : index
    %44 = vector.load %arg7[%c56, %c0_54] : memref<72x288xbf16, #tpu.memory_space<vmem>>, vector<4x288xbf16>
    tpu.vector_store %arg7[%c56, %c0_54], %43 {strides = array<i32>} : memref<72x288xbf16, #tpu.memory_space<vmem>>, vector<4x288xbf16>,
    %c0_55 = arith.constant 0 : index
    %c0_56 = arith.constant 0 : index
    %c37_57 = arith.constant 37 : index
    %45 = vector.load %arg2[%c0_55, %c0_56, %c37_57] : memref<1x4x342xbf16, #tpu.memory_space<vmem>>, vector<1x4x288xbf16>
    %46 = vector.shape_cast %45 : vector<1x4x288xbf16> to vector<4x288xbf16>
    %c60 = arith.constant 60 : index
    %c0_58 = arith.constant 0 : index
    %47 = vector.load %arg7[%c60, %c0_58] : memref<72x288xbf16, #tpu.memory_space<vmem>>, vector<4x288xbf16>
    tpu.vector_store %arg7[%c60, %c0_58], %46 {strides = array<i32>} : memref<72x288xbf16, #tpu.memory_space<vmem>>, vector<4x288xbf16>,
    %c0_59 = arith.constant 0 : index
    %c0_60 = arith.constant 0 : index
    %c38 = arith.constant 38 : index
    %48 = vector.load %arg1[%c0_59, %c0_60, %c38] : memref<1x4x342xbf16, #tpu.memory_space<vmem>>, vector<1x4x288xbf16>
    %49 = vector.shape_cast %48 : vector<1x4x288xbf16> to vector<4x288xbf16>
    %c64 = arith.constant 64 : index
    %c0_61 = arith.constant 0 : index
    %50 = vector.load %arg7[%c64, %c0_61] : memref<72x288xbf16, #tpu.memory_space<vmem>>, vector<4x288xbf16>
    tpu.vector_store %arg7[%c64, %c0_61], %49 {strides = array<i32>} : memref<72x288xbf16, #tpu.memory_space<vmem>>, vector<4x288xbf16>,
    %c0_62 = arith.constant 0 : index
    %c0_63 = arith.constant 0 : index
    %c38_64 = arith.constant 38 : index
    %51 = vector.load %arg2[%c0_62, %c0_63, %c38_64] : memref<1x4x342xbf16, #tpu.memory_space<vmem>>, vector<1x4x288xbf16>
    %52 = vector.shape_cast %51 : vector<1x4x288xbf16> to vector<4x288xbf16>
    %c68 = arith.constant 68 : index
    %c0_65 = arith.constant 0 : index
    %53 = vector.load %arg7[%c68, %c0_65] : memref<72x288xbf16, #tpu.memory_space<vmem>>, vector<4x288xbf16>
    tpu.vector_store %arg7[%c68, %c0_65], %52 {strides = array<i32>} : memref<72x288xbf16, #tpu.memory_space<vmem>>, vector<4x288xbf16>,
    %c0_66 = arith.constant 0 : index
    %c0_67 = arith.constant 0 : index
    %54 = vector.load %arg3[%c0_66, %c0_67] : memref<4x72xbf16, #tpu.memory_space<vmem>>, vector<4x72xbf16>
    %c0_68 = arith.constant 0 : index
    %c0_69 = arith.constant 0 : index
    %55 = vector.load %arg7[%c0_68, %c0_69] : memref<72x288xbf16, #tpu.memory_space<vmem>>, vector<72x288xbf16>
    %cst = arith.constant dense<0.000000e+00> : vector<4x288xf32>
    %56 = tpu.matmul %54, %55, %cst {dimension_numbers = #tpu.dot_dimension_numbers<[1], [0], [0], [1], [0, 0, 1, 1], [], []>} : vector<4x72xbf16>, vector<72x288xbf16>, vector<4x288xf32> -> vector<4x288xf32>
    %c0_70 = arith.constant 0 : index
    %c0_71 = arith.constant 0 : index
    %57 = vector.load %arg4[%c0_70, %c0_71] : memref<1x288xf32, #tpu.memory_space<vmem>>, vector<1x288xf32>
    %58 = vector.broadcast %57 : vector<1x288xf32> to vector<4x288xf32>
    %59 = arith.mulf %56, %58 : vector<4x288xf32>
    %cst_72 = arith.constant dense<0.000000e+00> : vector<4xf32>
    %60 = vector.multi_reduction <add>, %59, %cst_72 [1] : vector<4x288xf32> to vector<4xf32>
    %61 = vector.shape_cast %60 : vector<4xf32> to vector<4x1xf32>
    %c0_73 = arith.constant 0 : index
    %c0_74 = arith.constant 0 : index
    %c0_75 = arith.constant 0 : index
    %62 = vector.load %arg6[%c0_73, %c0_74, %c0_75] : memref<1x4x2xf32, #tpu.memory_space<vmem>>, vector<1x4x1xf32>
    %63 = vector.shape_cast %62 : vector<1x4x1xf32> to vector<4x1xf32>
    %64 = vector.shape_cast %61 : vector<4x1xf32> to vector<1x4x1xf32>
    tpu.vector_store %arg6[%c0_73, %c0_74, %c0_75], %64 {strides = array<i32>} : memref<1x4x2xf32, #tpu.memory_space<vmem>>, vector<1x4x1xf32>,
    %65 = arith.mulf %59, %59 : vector<4x288xf32>
    %cst_76 = arith.constant dense<0.000000e+00> : vector<4xf32>
    %66 = vector.multi_reduction <add>, %65, %cst_76 [1] : vector<4x288xf32> to vector<4xf32>
    %67 = vector.shape_cast %66 : vector<4xf32> to vector<4x1xf32>
    %c0_77 = arith.constant 0 : index
    %c0_78 = arith.constant 0 : index
    %c1_79 = arith.constant 1 : index
    %68 = vector.load %arg6[%c0_77, %c0_78, %c1_79] : memref<1x4x2xf32, #tpu.memory_space<vmem>>, vector<1x4x1xf32>
    %69 = vector.shape_cast %68 : vector<1x4x1xf32> to vector<4x1xf32>
    %70 = vector.shape_cast %67 : vector<4x1xf32> to vector<1x4x1xf32>
    tpu.vector_store %arg6[%c0_77, %c0_78, %c1_79], %70 {strides = array<i32>} : memref<1x4x2xf32, #tpu.memory_space<vmem>>, vector<1x4x1xf32>,
    %cst_80 = arith.constant 0.000000e+00 : f32
    %71 = vector.broadcast %cst_80 : f32 to vector<4x342xf32>
    %c0_81 = arith.constant 0 : index
    %c0_82 = arith.constant 0 : index
    %c0_83 = arith.constant 0 : index
    %72 = vector.load %arg5[%c0_81, %c0_82, %c0_83] : memref<1x4x342xf32, #tpu.memory_space<vmem>>, vector<1x4x342xf32>
    %73 = vector.shape_cast %72 : vector<1x4x342xf32> to vector<4x342xf32>
    %74 = vector.shape_cast %71 : vector<4x342xf32> to vector<1x4x342xf32>
    tpu.vector_store %arg5[%c0_81, %c0_82, %c0_83], %74 {strides = array<i32>} : memref<1x4x342xf32, #tpu.memory_space<vmem>>, vector<1x4x342xf32>,
    %c0_84 = arith.constant 0 : index
    %c0_85 = arith.constant 0 : index
    %c19_86 = arith.constant 19 : index
    %75 = vector.load %arg5[%c0_84, %c0_85, %c19_86] : memref<1x4x342xf32, #tpu.memory_space<vmem>>, vector<1x4x288xf32>
    %76 = vector.shape_cast %75 : vector<1x4x288xf32> to vector<4x288xf32>
    %77 = vector.shape_cast %56 : vector<4x288xf32> to vector<1x4x288xf32>
    tpu.vector_store %arg5[%c0_84, %c0_85, %c19_86], %77 {strides = array<i32>} : memref<1x4x342xf32, #tpu.memory_space<vmem>>, vector<1x4x288xf32>,
    return
  }
  func.func @transform_0(%arg0: i32) -> (i32, i32, i32) {
    %c0_i32 = arith.constant 0 : i32
    %c0_i32_0 = arith.constant 0 : i32
    %c0_i32_1 = arith.constant 0 : i32
    return %arg0, %c0_i32, %c0_i32_0 : i32, i32, i32
  }
  func.func @transform_1(%arg0: i32) -> (i32, i32, i32) {
    %c0_i32 = arith.constant 0 : i32
    %c0_i32_0 = arith.constant 0 : i32
    %c0_i32_1 = arith.constant 0 : i32
    return %arg0, %c0_i32, %c0_i32_0 : i32, i32, i32
  }
  func.func @transform_2(%arg0: i32) -> (i32, i32) {
    %c0_i32 = arith.constant 0 : i32
    %c0_i32_0 = arith.constant 0 : i32
    %c0_i32_1 = arith.constant 0 : i32
    return %c0_i32, %c0_i32_0 : i32, i32
  }
  func.func @transform_3(%arg0: i32) -> (i32, i32) {
    %c0_i32 = arith.constant 0 : i32
    %c0_i32_0 = arith.constant 0 : i32
    %c0_i32_1 = arith.constant 0 : i32
    return %c0_i32, %c0_i32_0 : i32, i32
  }
  func.func @transform_4(%arg0: i32) -> (i32, i32, i32) {
    %c0_i32 = arith.constant 0 : i32
    %c0_i32_0 = arith.constant 0 : i32
    %c0_i32_1 = arith.constant 0 : i32
    return %arg0, %c0_i32, %c0_i32_0 : i32, i32, i32
  }
  func.func @transform_5(%arg0: i32) -> (i32, i32, i32) {
    %c0_i32 = arith.constant 0 : i32
    %c0_i32_0 = arith.constant 0 : i32
    %c0_i32_1 = arith.constant 0 : i32
    return %arg0, %c0_i32, %c0_i32_0 : i32, i32, i32
  }
}

module attributes {stable_mosaic.version = 11 : i64} {
  func.func @_dconv_norm_kernel(%arg0: i32, %arg1: memref<1x4x342xf32, #tpu.memory_space<vmem>>, %arg2: memref<4x1xf32, #tpu.memory_space<vmem>>, %arg3: memref<4x1xf32, #tpu.memory_space<vmem>>, %arg4: memref<1x342xf32, #tpu.memory_space<vmem>>, %arg5: memref<4x36xbf16, #tpu.memory_space<vmem>>, %arg6: memref<1x288xf32, #tpu.memory_space<vmem>>, %arg7: memref<1x4x342xf32, #tpu.memory_space<vmem>>, %arg8: memref<1x4x2xf32, #tpu.memory_space<vmem>>, %arg9: memref<4x342xbf16, #tpu.memory_space<vmem>>, %arg10: memref<36x288xbf16, #tpu.memory_space<vmem>>) attributes {dimension_semantics = [#tpu.dimension_semantics<parallel>], iteration_bounds = array<i64: 2>, scalar_prefetch = 0 : i64, scratch_operands = 2 : i64, tpu.core_type = #tpu.core_type<tc>, window_params = [{transform_indices = @transform_0, window_bounds = array<i64: 1, 4, 342>}, {pipeline_mode = #tpu.pipeline_mode<synchronous>, transform_indices = @transform_1, window_bounds = array<i64: 4, 1>}, {pipeline_mode = #tpu.pipeline_mode<synchronous>, transform_indices = @transform_2, window_bounds = array<i64: 4, 1>}, {pipeline_mode = #tpu.pipeline_mode<synchronous>, transform_indices = @transform_3, window_bounds = array<i64: 1, 342>}, {pipeline_mode = #tpu.pipeline_mode<synchronous>, transform_indices = @transform_4, window_bounds = array<i64: 4, 36>}, {pipeline_mode = #tpu.pipeline_mode<synchronous>, transform_indices = @transform_5, window_bounds = array<i64: 1, 288>}, {transform_indices = @transform_6, window_bounds = array<i64: 1, 4, 342>}, {transform_indices = @transform_7, window_bounds = array<i64: 1, 4, 2>}]} {
    %c0 = arith.constant 0 : index
    %c0_0 = arith.constant 0 : index
    %0 = vector.load %arg2[%c0, %c0_0] : memref<4x1xf32, #tpu.memory_space<vmem>>, vector<4x1xf32>
    %c0_1 = arith.constant 0 : index
    %c0_2 = arith.constant 0 : index
    %c0_3 = arith.constant 0 : index
    %1 = vector.load %arg1[%c0_1, %c0_2, %c0_3] : memref<1x4x342xf32, #tpu.memory_space<vmem>>, vector<1x4x342xf32>
    %2 = vector.shape_cast %1 : vector<1x4x342xf32> to vector<4x342xf32>
    %3 = vector.broadcast %0 : vector<4x1xf32> to vector<4x342xf32>
    %4 = arith.mulf %3, %2 : vector<4x342xf32>
    %c0_4 = arith.constant 0 : index
    %c0_5 = arith.constant 0 : index
    %5 = vector.load %arg3[%c0_4, %c0_5] : memref<4x1xf32, #tpu.memory_space<vmem>>, vector<4x1xf32>
    %6 = vector.broadcast %5 : vector<4x1xf32> to vector<4x342xf32>
    %7 = arith.addf %4, %6 : vector<4x342xf32>
    %cst = arith.constant 0.000000e+00 : f32
    %8 = vector.broadcast %cst : f32 to vector<4x342xf32>
    %9 = arith.maximumf %7, %8 : vector<4x342xf32>
    %c0_6 = arith.constant 0 : index
    %c0_7 = arith.constant 0 : index
    %10 = vector.load %arg4[%c0_6, %c0_7] : memref<1x342xf32, #tpu.memory_space<vmem>>, vector<1x342xf32>
    %11 = vector.broadcast %10 : vector<1x342xf32> to vector<4x342xf32>
    %12 = arith.mulf %9, %11 : vector<4x342xf32>
    %13 = arith.truncf %12 : vector<4x342xf32> to vector<4x342xbf16>
    %c0_8 = arith.constant 0 : index
    %c0_9 = arith.constant 0 : index
    %14 = vector.load %arg9[%c0_8, %c0_9] : memref<4x342xbf16, #tpu.memory_space<vmem>>, vector<4x342xbf16>
    tpu.vector_store %arg9[%c0_8, %c0_9], %13 {strides = array<i32>} : memref<4x342xbf16, #tpu.memory_space<vmem>>, vector<4x342xbf16>,
    %c0_10 = arith.constant 0 : index
    %c0_11 = arith.constant 0 : index
    %15 = vector.load %arg9[%c0_10, %c0_11] : memref<4x342xbf16, #tpu.memory_space<vmem>>, vector<4x288xbf16>
    %c0_12 = arith.constant 0 : index
    %c0_13 = arith.constant 0 : index
    %16 = vector.load %arg10[%c0_12, %c0_13] : memref<36x288xbf16, #tpu.memory_space<vmem>>, vector<4x288xbf16>
    tpu.vector_store %arg10[%c0_12, %c0_13], %15 {strides = array<i32>} : memref<36x288xbf16, #tpu.memory_space<vmem>>, vector<4x288xbf16>,
    %c0_14 = arith.constant 0 : index
    %c1 = arith.constant 1 : index
    %17 = vector.load %arg9[%c0_14, %c1] : memref<4x342xbf16, #tpu.memory_space<vmem>>, vector<4x288xbf16>
    %c4 = arith.constant 4 : index
    %c0_15 = arith.constant 0 : index
    %18 = vector.load %arg10[%c4, %c0_15] : memref<36x288xbf16, #tpu.memory_space<vmem>>, vector<4x288xbf16>
    tpu.vector_store %arg10[%c4, %c0_15], %17 {strides = array<i32>} : memref<36x288xbf16, #tpu.memory_space<vmem>>, vector<4x288xbf16>,
    %c0_16 = arith.constant 0 : index
    %c2 = arith.constant 2 : index
    %19 = vector.load %arg9[%c0_16, %c2] : memref<4x342xbf16, #tpu.memory_space<vmem>>, vector<4x288xbf16>
    %c8 = arith.constant 8 : index
    %c0_17 = arith.constant 0 : index
    %20 = vector.load %arg10[%c8, %c0_17] : memref<36x288xbf16, #tpu.memory_space<vmem>>, vector<4x288xbf16>
    tpu.vector_store %arg10[%c8, %c0_17], %19 {strides = array<i32>} : memref<36x288xbf16, #tpu.memory_space<vmem>>, vector<4x288xbf16>,
    %c0_18 = arith.constant 0 : index
    %c18 = arith.constant 18 : index
    %21 = vector.load %arg9[%c0_18, %c18] : memref<4x342xbf16, #tpu.memory_space<vmem>>, vector<4x288xbf16>
    %c12 = arith.constant 12 : index
    %c0_19 = arith.constant 0 : index
    %22 = vector.load %arg10[%c12, %c0_19] : memref<36x288xbf16, #tpu.memory_space<vmem>>, vector<4x288xbf16>
    tpu.vector_store %arg10[%c12, %c0_19], %21 {strides = array<i32>} : memref<36x288xbf16, #tpu.memory_space<vmem>>, vector<4x288xbf16>,
    %c0_20 = arith.constant 0 : index
    %c19 = arith.constant 19 : index
    %23 = vector.load %arg9[%c0_20, %c19] : memref<4x342xbf16, #tpu.memory_space<vmem>>, vector<4x288xbf16>
    %c16 = arith.constant 16 : index
    %c0_21 = arith.constant 0 : index
    %24 = vector.load %arg10[%c16, %c0_21] : memref<36x288xbf16, #tpu.memory_space<vmem>>, vector<4x288xbf16>
    tpu.vector_store %arg10[%c16, %c0_21], %23 {strides = array<i32>} : memref<36x288xbf16, #tpu.memory_space<vmem>>, vector<4x288xbf16>,
    %c0_22 = arith.constant 0 : index
    %c20 = arith.constant 20 : index
    %25 = vector.load %arg9[%c0_22, %c20] : memref<4x342xbf16, #tpu.memory_space<vmem>>, vector<4x288xbf16>
    %c20_23 = arith.constant 20 : index
    %c0_24 = arith.constant 0 : index
    %26 = vector.load %arg10[%c20_23, %c0_24] : memref<36x288xbf16, #tpu.memory_space<vmem>>, vector<4x288xbf16>
    tpu.vector_store %arg10[%c20_23, %c0_24], %25 {strides = array<i32>} : memref<36x288xbf16, #tpu.memory_space<vmem>>, vector<4x288xbf16>,
    %c0_25 = arith.constant 0 : index
    %c36 = arith.constant 36 : index
    %27 = vector.load %arg9[%c0_25, %c36] : memref<4x342xbf16, #tpu.memory_space<vmem>>, vector<4x288xbf16>
    %c24 = arith.constant 24 : index
    %c0_26 = arith.constant 0 : index
    %28 = vector.load %arg10[%c24, %c0_26] : memref<36x288xbf16, #tpu.memory_space<vmem>>, vector<4x288xbf16>
    tpu.vector_store %arg10[%c24, %c0_26], %27 {strides = array<i32>} : memref<36x288xbf16, #tpu.memory_space<vmem>>, vector<4x288xbf16>,
    %c0_27 = arith.constant 0 : index
    %c37 = arith.constant 37 : index
    %29 = vector.load %arg9[%c0_27, %c37] : memref<4x342xbf16, #tpu.memory_space<vmem>>, vector<4x288xbf16>
    %c28 = arith.constant 28 : index
    %c0_28 = arith.constant 0 : index
    %30 = vector.load %arg10[%c28, %c0_28] : memref<36x288xbf16, #tpu.memory_space<vmem>>, vector<4x288xbf16>
    tpu.vector_store %arg10[%c28, %c0_28], %29 {strides = array<i32>} : memref<36x288xbf16, #tpu.memory_space<vmem>>, vector<4x288xbf16>,
    %c0_29 = arith.constant 0 : index
    %c38 = arith.constant 38 : index
    %31 = vector.load %arg9[%c0_29, %c38] : memref<4x342xbf16, #tpu.memory_space<vmem>>, vector<4x288xbf16>
    %c32 = arith.constant 32 : index
    %c0_30 = arith.constant 0 : index
    %32 = vector.load %arg10[%c32, %c0_30] : memref<36x288xbf16, #tpu.memory_space<vmem>>, vector<4x288xbf16>
    tpu.vector_store %arg10[%c32, %c0_30], %31 {strides = array<i32>} : memref<36x288xbf16, #tpu.memory_space<vmem>>, vector<4x288xbf16>,
    %c0_31 = arith.constant 0 : index
    %c0_32 = arith.constant 0 : index
    %33 = vector.load %arg5[%c0_31, %c0_32] : memref<4x36xbf16, #tpu.memory_space<vmem>>, vector<4x36xbf16>
    %c0_33 = arith.constant 0 : index
    %c0_34 = arith.constant 0 : index
    %34 = vector.load %arg10[%c0_33, %c0_34] : memref<36x288xbf16, #tpu.memory_space<vmem>>, vector<36x288xbf16>
    %cst_35 = arith.constant dense<0.000000e+00> : vector<4x288xf32>
    %35 = tpu.matmul %33, %34, %cst_35 {dimension_numbers = #tpu.dot_dimension_numbers<[1], [0], [0], [1], [0, 0, 1, 1], [], []>} : vector<4x36xbf16>, vector<36x288xbf16>, vector<4x288xf32> -> vector<4x288xf32>
    %c0_36 = arith.constant 0 : index
    %c0_37 = arith.constant 0 : index
    %36 = vector.load %arg6[%c0_36, %c0_37] : memref<1x288xf32, #tpu.memory_space<vmem>>, vector<1x288xf32>
    %37 = vector.broadcast %36 : vector<1x288xf32> to vector<4x288xf32>
    %38 = arith.mulf %35, %37 : vector<4x288xf32>
    %cst_38 = arith.constant dense<0.000000e+00> : vector<4xf32>
    %39 = vector.multi_reduction <add>, %38, %cst_38 [1] : vector<4x288xf32> to vector<4xf32>
    %40 = vector.shape_cast %39 : vector<4xf32> to vector<4x1xf32>
    %c0_39 = arith.constant 0 : index
    %c0_40 = arith.constant 0 : index
    %c0_41 = arith.constant 0 : index
    %41 = vector.load %arg8[%c0_39, %c0_40, %c0_41] : memref<1x4x2xf32, #tpu.memory_space<vmem>>, vector<1x4x1xf32>
    %42 = vector.shape_cast %41 : vector<1x4x1xf32> to vector<4x1xf32>
    %43 = vector.shape_cast %40 : vector<4x1xf32> to vector<1x4x1xf32>
    tpu.vector_store %arg8[%c0_39, %c0_40, %c0_41], %43 {strides = array<i32>} : memref<1x4x2xf32, #tpu.memory_space<vmem>>, vector<1x4x1xf32>,
    %44 = arith.mulf %38, %38 : vector<4x288xf32>
    %cst_42 = arith.constant dense<0.000000e+00> : vector<4xf32>
    %45 = vector.multi_reduction <add>, %44, %cst_42 [1] : vector<4x288xf32> to vector<4xf32>
    %46 = vector.shape_cast %45 : vector<4xf32> to vector<4x1xf32>
    %c0_43 = arith.constant 0 : index
    %c0_44 = arith.constant 0 : index
    %c1_45 = arith.constant 1 : index
    %47 = vector.load %arg8[%c0_43, %c0_44, %c1_45] : memref<1x4x2xf32, #tpu.memory_space<vmem>>, vector<1x4x1xf32>
    %48 = vector.shape_cast %47 : vector<1x4x1xf32> to vector<4x1xf32>
    %49 = vector.shape_cast %46 : vector<4x1xf32> to vector<1x4x1xf32>
    tpu.vector_store %arg8[%c0_43, %c0_44, %c1_45], %49 {strides = array<i32>} : memref<1x4x2xf32, #tpu.memory_space<vmem>>, vector<1x4x1xf32>,
    %cst_46 = arith.constant 0.000000e+00 : f32
    %50 = vector.broadcast %cst_46 : f32 to vector<4x342xf32>
    %c0_47 = arith.constant 0 : index
    %c0_48 = arith.constant 0 : index
    %c0_49 = arith.constant 0 : index
    %51 = vector.load %arg7[%c0_47, %c0_48, %c0_49] : memref<1x4x342xf32, #tpu.memory_space<vmem>>, vector<1x4x342xf32>
    %52 = vector.shape_cast %51 : vector<1x4x342xf32> to vector<4x342xf32>
    %53 = vector.shape_cast %50 : vector<4x342xf32> to vector<1x4x342xf32>
    tpu.vector_store %arg7[%c0_47, %c0_48, %c0_49], %53 {strides = array<i32>} : memref<1x4x342xf32, #tpu.memory_space<vmem>>, vector<1x4x342xf32>,
    %c0_50 = arith.constant 0 : index
    %c0_51 = arith.constant 0 : index
    %c19_52 = arith.constant 19 : index
    %54 = vector.load %arg7[%c0_50, %c0_51, %c19_52] : memref<1x4x342xf32, #tpu.memory_space<vmem>>, vector<1x4x288xf32>
    %55 = vector.shape_cast %54 : vector<1x4x288xf32> to vector<4x288xf32>
    %56 = vector.shape_cast %35 : vector<4x288xf32> to vector<1x4x288xf32>
    tpu.vector_store %arg7[%c0_50, %c0_51, %c19_52], %56 {strides = array<i32>} : memref<1x4x342xf32, #tpu.memory_space<vmem>>, vector<1x4x288xf32>,
    return
  }
  func.func @transform_0(%arg0: i32) -> (i32, i32, i32) {
    %c0_i32 = arith.constant 0 : i32
    %c0_i32_0 = arith.constant 0 : i32
    %c0_i32_1 = arith.constant 0 : i32
    return %arg0, %c0_i32, %c0_i32_0 : i32, i32, i32
  }
  func.func @transform_1(%arg0: i32) -> (i32, i32) {
    %c0_i32 = arith.constant 0 : i32
    %c0_i32_0 = arith.constant 0 : i32
    %c0_i32_1 = arith.constant 0 : i32
    return %c0_i32, %c0_i32_0 : i32, i32
  }
  func.func @transform_2(%arg0: i32) -> (i32, i32) {
    %c0_i32 = arith.constant 0 : i32
    %c0_i32_0 = arith.constant 0 : i32
    %c0_i32_1 = arith.constant 0 : i32
    return %c0_i32, %c0_i32_0 : i32, i32
  }
  func.func @transform_3(%arg0: i32) -> (i32, i32) {
    %c0_i32 = arith.constant 0 : i32
    %c0_i32_0 = arith.constant 0 : i32
    %c0_i32_1 = arith.constant 0 : i32
    return %c0_i32, %c0_i32_0 : i32, i32
  }
  func.func @transform_4(%arg0: i32) -> (i32, i32) {
    %c0_i32 = arith.constant 0 : i32
    %c0_i32_0 = arith.constant 0 : i32
    %c0_i32_1 = arith.constant 0 : i32
    return %c0_i32, %c0_i32_0 : i32, i32
  }
  func.func @transform_5(%arg0: i32) -> (i32, i32) {
    %c0_i32 = arith.constant 0 : i32
    %c0_i32_0 = arith.constant 0 : i32
    %c0_i32_1 = arith.constant 0 : i32
    return %c0_i32, %c0_i32_0 : i32, i32
  }
  func.func @transform_6(%arg0: i32) -> (i32, i32, i32) {
    %c0_i32 = arith.constant 0 : i32
    %c0_i32_0 = arith.constant 0 : i32
    %c0_i32_1 = arith.constant 0 : i32
    return %arg0, %c0_i32, %c0_i32_0 : i32, i32, i32
  }
  func.func @transform_7(%arg0: i32) -> (i32, i32, i32) {
    %c0_i32 = arith.constant 0 : i32
    %c0_i32_0 = arith.constant 0 : i32
    %c0_i32_1 = arith.constant 0 : i32
    return %arg0, %c0_i32, %c0_i32_0 : i32, i32, i32
  }
}

module attributes {stable_mosaic.version = 11 : i64} {
  func.func @_bn_relu_kernel(%arg0: i32, %arg1: i32, %arg2: memref<1x4x342xf32, #tpu.memory_space<vmem>>, %arg3: memref<4x1xf32, #tpu.memory_space<vmem>>, %arg4: memref<4x1xf32, #tpu.memory_space<vmem>>, %arg5: memref<1x4x342xf32, #tpu.memory_space<vmem>>) attributes {dimension_semantics = [#tpu.dimension_semantics<parallel>, #tpu.dimension_semantics<parallel>], iteration_bounds = array<i64: 2, 1>, scalar_prefetch = 0 : i64, scratch_operands = 0 : i64, tpu.core_type = #tpu.core_type<tc>, window_params = [{transform_indices = @transform_0, window_bounds = array<i64: 1, 4, 342>}, {pipeline_mode = #tpu.pipeline_mode<synchronous>, transform_indices = @transform_1, window_bounds = array<i64: 4, 1>}, {pipeline_mode = #tpu.pipeline_mode<synchronous>, transform_indices = @transform_2, window_bounds = array<i64: 4, 1>}, {transform_indices = @transform_3, window_bounds = array<i64: 1, 4, 342>}]} {
    %c0 = arith.constant 0 : index
    %c0_0 = arith.constant 0 : index
    %0 = vector.load %arg3[%c0, %c0_0] : memref<4x1xf32, #tpu.memory_space<vmem>>, vector<4x1xf32>
    %c0_1 = arith.constant 0 : index
    %c0_2 = arith.constant 0 : index
    %c0_3 = arith.constant 0 : index
    %1 = vector.load %arg2[%c0_1, %c0_2, %c0_3] : memref<1x4x342xf32, #tpu.memory_space<vmem>>, vector<1x4x342xf32>
    %2 = vector.shape_cast %1 : vector<1x4x342xf32> to vector<4x342xf32>
    %3 = vector.broadcast %0 : vector<4x1xf32> to vector<4x342xf32>
    %4 = arith.mulf %3, %2 : vector<4x342xf32>
    %c0_4 = arith.constant 0 : index
    %c0_5 = arith.constant 0 : index
    %5 = vector.load %arg4[%c0_4, %c0_5] : memref<4x1xf32, #tpu.memory_space<vmem>>, vector<4x1xf32>
    %6 = vector.broadcast %5 : vector<4x1xf32> to vector<4x342xf32>
    %7 = arith.addf %4, %6 : vector<4x342xf32>
    %cst = arith.constant 0.000000e+00 : f32
    %8 = vector.broadcast %cst : f32 to vector<4x342xf32>
    %9 = arith.maximumf %7, %8 : vector<4x342xf32>
    %c0_6 = arith.constant 0 : index
    %c0_7 = arith.constant 0 : index
    %c0_8 = arith.constant 0 : index
    %10 = vector.load %arg5[%c0_6, %c0_7, %c0_8] : memref<1x4x342xf32, #tpu.memory_space<vmem>>, vector<1x4x342xf32>
    %11 = vector.shape_cast %10 : vector<1x4x342xf32> to vector<4x342xf32>
    %12 = vector.shape_cast %9 : vector<4x342xf32> to vector<1x4x342xf32>
    tpu.vector_store %arg5[%c0_6, %c0_7, %c0_8], %12 {strides = array<i32>} : memref<1x4x342xf32, #tpu.memory_space<vmem>>, vector<1x4x342xf32>,
    return
  }
  func.func @transform_0(%arg0: i32, %arg1: i32) -> (i32, i32, i32) {
    %c0_i32 = arith.constant 0 : i32
    %c0_i32_0 = arith.constant 0 : i32
    return %arg0, %c0_i32, %arg1 : i32, i32, i32
  }
  func.func @transform_1(%arg0: i32, %arg1: i32) -> (i32, i32) {
    %c0_i32 = arith.constant 0 : i32
    %c0_i32_0 = arith.constant 0 : i32
    %c0_i32_1 = arith.constant 0 : i32
    return %c0_i32, %c0_i32_0 : i32, i32
  }
  func.func @transform_2(%arg0: i32, %arg1: i32) -> (i32, i32) {
    %c0_i32 = arith.constant 0 : i32
    %c0_i32_0 = arith.constant 0 : i32
    %c0_i32_1 = arith.constant 0 : i32
    return %c0_i32, %c0_i32_0 : i32, i32
  }
  func.func @transform_3(%arg0: i32, %arg1: i32) -> (i32, i32, i32) {
    %c0_i32 = arith.constant 0 : i32
    %c0_i32_0 = arith.constant 0 : i32
    return %arg0, %c0_i32, %arg1 : i32, i32, i32
  }
}

</mosaic_0001>

<bundles_post_ra>
// kernel: tile.8
= control target key start
LH: loop header
LB: loop body
LE: loop exit
PB: predicated region body
PF: predicated region fallthrough
CT: control target
= control target key end

     0   :  { %s22_s0 = inlined_call_operand.vmem [shape: f32[4], index: 0, kind: input, shape index: {}]   ;;  %s23_s1 = inlined_call_operand.vmem [shape: f32[4,4], index: 1, kind: output, shape index: {}]  }
   0x1   :  { %v4_v0 = vld [vmem:[%s22_s0] ss:$0 sm:$0xff] }
   0x2   :  { %5 = vst [vmem:[%s23_s1] sm:$0xf] %v4_v0 }

// kernel: tile.0
= control target key start
LH: loop header
LB: loop body
LE: loop exit
PB: predicated region body
PF: predicated region fallthrough
CT: control target
= control target key end

     0   :  { %s34_s8 = smov 125   ;;  %vm7_vm0 = vcmask 7168   ;;  %s35_s11 = smov 126   ;;  %s61_s0 = inlined_call_operand.vmem [shape: f32[4,4], index: 0, kind: input, shape index: {}]   ;;  %s62_s1 = inlined_call_operand.vmem [shape: f32[16,1], index: 1, kind: output, shape index: {}]  }
   0x1   :  { %v4_v0 = vld [vmem:[%s61_s0] sm:$0xf]  ;;  %s33_s0 = smov 127  }
   0x2   :  { %5 = vst [vmem:[#allocation0] sm:$0xf] %v4_v0 }
   0x9   :  { %v9_v1 = vld [vmem:[#allocation0] sm:$0xf]  }
   0xa   :  { %v21_v2 = vld [vmem:[#allocation0] sm:$0xf]   ;;  %10 = vrot.lane.b32.xlu0 %v9_v1, %s33_s0 }
   0xb   :  { %22 = vrot.lane.b32.xlu1 %v21_v2, %s34_s8  ;;  %v6_v3 = vld [vmem:[#allocation0] sm:$0xf]  }
   0xc   :  { %v15_v4 = vld [vmem:[#allocation0] sm:$0xf]   ;;  %8 = vst.msk [vmem:[%s62_s1] ss:$4 sm:$0xf] %vm7_vm0, %v6_v3  }
   0xe   :  { %16 = vrot.lane.b32.xlu0 %v15_v4, %s35_s11 }
  0x7c   :  { %v11_v5 = vpop.permute.xlu0 %10  }
  0x7d   :  { %v23_v6 = vpop.permute.xlu1 %22   ;;  %27 = vst.msk [vmem:[%s62_s1 + $0x1] ss:$4 sm:$0xf] %vm7_vm0, %v11_v5  }
  0x7e   :  { %29 = vst.msk [vmem:[%s62_s1 + $0x3] ss:$4 sm:$0xf] %vm7_vm0, %v23_v6  }
  0x80   :  { %v17_v7 = vpop.permute.xlu0 %16  }
  0x81   :  { %28 = vst.msk [vmem:[%s62_s1 + $0x2] ss:$4 sm:$0xf] %vm7_vm0, %v17_v7  }

// kernel: up_forward.4
= control target key start
LH: loop header
LB: loop body
LE: loop exit
PB: predicated region body
PF: predicated region fallthrough
CT: control target
= control target key end

     0   :  { %s461_s12 = smov 0   ;;  %s463_s13 = smov 0   ;;  %s503_s0 = inlined_call_operand.vmem [shape: bf16[2,8,64], index: 0, kind: input, shape index: {}]   ;;  %s504_s1 = inlined_call_operand.vmem [shape: bf16[16,8], index: 1, kind: input, shape index: {}]   ;;  %s505_s2 = inlined_call_operand.vmem [shape: f32[16,1], index: 2, kind: input, shape index: {}]   ;;  %s506_s3 = inlined_call_operand.vmem [shape: bf16[2,16,64], index: 3, kind: output, shape index: {}]  }
   0x1   :  { %s465_s14 = smov 0  }
   0x2 LB: > { %s25_s15 = sadd.s32 1, %s432_s13  ;;  %p364_p0 = scmp.ge.s32.totalorder %s436_s14, 1  ;;  %s436_s14 = sphi %s465_s14, %s13_s14   ;;  %s432_s13 = sphi %s463_s13, %s508_s13   ;;  %s428_s12 = sphi %s461_s12, %s507_s12  }
   0x3   : > { %p27_p1 = scmp.ge.s32.totalorder %s25_s15, 2  ;;  %p155_p2 = scmp.lt.s32.totalorder %s436_s14, 3 }
   0x5   : > { %s510_s15 = smov (%p27_p1, %s25_s15), 0  ;;  %p156_p3 = pnand %p364_p0, %p155_p2 }
   0x6   : > { %p184_p4 = scmp.lt.s32.totalorder (!%p156_p3), %s428_s12, 1  ;;  %v438_v0 = vmov (!%p156_p3), 0.0   ;;  %vm439_vm0 = vmmov (!%p156_p3), 0   ;;  %v203_v1 = vld [vmem:[%s505_s2] sm:$0xff] (!%p156_p3)  ;;  %v440_v2 = vmov (!%p156_p3), 0   ;;  %vm224_vm1 = vcmask (!%p156_p3), 1043456  }
   0x7   : > { %159 = sbr.rel (%p156_p3) target bundleno = 241 (0xf1), region = 32  ;;  %379 = vmatprep.subr.bf16.mxu0 (!%p156_p3), %v438_v0  ;;  %381 = vmatprep.mubr.msk.bf16.mxu0 (!%p156_p3), %vm439_vm0, %v438_v0  ;;  %v204_v3 = vld [vmem:[%s505_s2 + $0x8] sm:$0xff] (!%p156_p3)  ;;  %v413_v6 = vld [vmem:[%s504_s1] sm:$0xff] (!%p156_p3)   ;;  %vm220_vm2 = vcmask (!%p156_p3), 64512   ;;  %vm277_vm3 = vcmask (!%p156_p3), 519168  }
   0x8   : > { %412 = vset.pattern.permute.xlu0 (!%p156_p3), %v440_v2 }
   0x9   : > { %207 = vperm.xlu0 (!%p156_p3), %412, %v203_v1  }
   0xd   : > { %212 = vperm.xlu0 (!%p156_p3), %412, %v204_v3  }
   0xe   : > { %s512_s12 = smov (!%p184_p4, %s428_s12), 1 }
   0xf   : > { %s365_s18 = sshll.u32 %s512_s12, 2  ;;  %s374_s26 = sshll.u32 %s512_s12, 3 }
  0x10   : > { %s190_s23 = scalar_lea.vmem %s503_s0, %s365_s18  ;;  %s198_s29 = scalar_lea.vmem %s506_s3, %s374_s26 }
  0x11   : > { %v202_v4 = vld [vmem:[%s190_s23] sm:$0xf] }
  0x12   : > { %v226_v5 = vsel %vm224_vm1, %v202_v4, 0 }
  0x13   : > { %380 = vmatpush3.bf16.msra.mxu0 %v226_v5 }
  0x16   : > { %382 = vmatmul.mubr.msk.bf16.vlgmr.msra.gmra.mrb[0].mxu0 %vm220_vm2, %v413_v6 }
  0x88   : > { %v208_v7 = vpop.permute.xlu0 %207 }
  0x8c   : > { %v213_v11 = vpop.permute.xlu0 %212 }
  0xe9   : > { %v262_v8 = vpop.f32.mrb[0].mxu0 }
  0xea   : > { %v263_v9 = vadd.f32 %v262_v8, %v208_v7  ;;  %v383_v10 = vpop.f32.mrb[1].mxu0 }
  0xeb   : > { %v265_v12 = vpop.f32.mrb[2].mxu0 }
  0xec   : > { %v375_v13 = vpack.c.bf16 %v263_v9, %v263_v9  ;;  %v266_v14 = vadd.f32 %v265_v12, %v213_v11  ;;  %v384_v15 = vpop.f32.mrb[3].mxu0 }
  0xee   : > { %278 = vst.msk [vmem:[%s198_s29] sm:$0xf] %vm277_vm3, %v375_v13  ;;  %v376_v16 = vpack.c.bf16 %v266_v14, %v266_v14 }
  0xf0   : > { %279 = vst.msk [vmem:[%s198_s29 + $0x4] sm:$0xf] %vm277_vm3, %v376_v16 }
  0xf1 PF: > { %s13_s14 = sadd.s32 1, %s436_s14   ;;  %s507_s12 = smov %s432_s13 }
  0xf2   : > { %p10_p5 = scmp.ge.s32.totalorder %s13_s14, 4   ;;  %s508_s13 = smov %s510_s15 }
  0xf4   :  { %12 = sbr.rel (!%p10_p5) target bundleno = 2 (0x2), region = 62 }

// kernel: up_forward.7
= control target key start
LH: loop header
LB: loop body
LE: loop exit
PB: predicated region body
PF: predicated region fallthrough
CT: control target
= control target key end

     0   :  { %s412_s12 = smov 0   ;;  %s414_s13 = smov 0   ;;  %s451_s0 = inlined_call_operand.vmem [shape: f32[2,4,342], index: 0, kind: input, shape index: {}]   ;;  %s452_s1 = inlined_call_operand.vmem [shape: f32[4,1], index: 1, kind: input, shape index: {}]   ;;  %s453_s2 = inlined_call_operand.vmem [shape: f32[4,1], index: 2, kind: input, shape index: {}]   ;;  %s454_s3 = inlined_call_operand.vmem [shape: f32[2,4,342], index: 3, kind: output, shape index: {}]  }
   0x1   :  { %s416_s14 = smov 0  }
   0x2 LB: > { %s25_s15 = sadd.s32 1, %s385_s13  ;;  %p334_p0 = scmp.ge.s32.totalorder %s389_s14, 1  ;;  %s389_s14 = sphi %s416_s14, %s13_s14   ;;  %s385_s13 = sphi %s414_s13, %s456_s13   ;;  %s381_s12 = sphi %s412_s12, %s455_s12  }
   0x3   : > { %p27_p1 = scmp.ge.s32.totalorder %s25_s15, 2  ;;  %p158_p2 = scmp.lt.s32.totalorder %s389_s14, 3 }
   0x5   : > { %s458_s15 = smov (%p27_p1, %s25_s15), 0  ;;  %p159_p3 = pnand %p334_p0, %p158_p2 }
   0x6   : > { %v210_v0 = vld [vmem:[%s452_s1] sm:$0xf] (!%p159_p3)  ;;  %v391_v1 = vmov (!%p159_p3), 0   ;;  %p191_p4 = scmp.lt.s32.totalorder (!%p159_p3), %s381_s12, 1  ;;  %vm241_vm0 = vcmask (!%p159_p3), 699392  }
   0x7   : > { %162 = sbr.rel (%p159_p3) target bundleno = 147 (0x93), region = 32  ;;  %365 = vset.pattern.permute.xlu0 (!%p159_p3), %v391_v1  ;;  %v224_v2 = vld [vmem:[%s453_s2] sm:$0xf] (!%p159_p3) }
   0x8   : > { %215 = vperm.xlu0 (!%p159_p3), %365, %v210_v0  }
   0xc   : > { %227 = vperm.xlu0 (!%p159_p3), %365, %v224_v2  }
   0xe   : > { %s460_s12 = smov (!%p191_p4, %s381_s12), 1 }
   0xf   : > { %s339_s20 = smul.u32 12, %s460_s12 }
  0x11   : > { %s198_s23 = scalar_lea.vmem %s451_s0, %s339_s20  ;;  %s208_s26 = scalar_lea.vmem %s454_s3, %s339_s20 }
  0x12   : > { %v211_v3 = vld [vmem:[%s198_s23] sm:$0xff]  ;;  %v212_v6 = vld [vmem:[%s198_s23 + $0x8] sm:$0xf] }
  0x13   : > { %v219_v4 = vcombine.high %v211_v3, %v211_v3 }
  0x87   : > { %v216_v5 = vpop.permute.xlu0 %215 }
  0x88   : > { %v221_v7 = vmul.f32 %v216_v5, %v211_v3  ;;  %v222_v8 = vmul.f32 %v219_v4, %v216_v5  ;;  %v223_v9 = vmul.f32 %v216_v5, %v212_v6 }
  0x8b   : > { %v228_v10 = vpop.permute.xlu0 %227 }
  0x8c   : > { %v230_v11 = vadd.f32 %v228_v10, %v221_v7  ;;  %v231_v12 = vadd.f32 %v228_v10, %v222_v8  ;;  %v232_v13 = vadd.f32 %v228_v10, %v223_v9 }
  0x8e   : > { %v233_v14 = vmax.f32 %v230_v11, 0.0  ;;  %v234_v15 = vmax.f32 %v231_v12, 0.0  ;;  %v235_v16 = vmax.f32 %v232_v13, 0.0 }
  0x90   : > { %v238_v17 = vcombine.low %v233_v14, %v234_v15  ;;  %242 = vst.msk [vmem:[%s208_s26 + $0x8] sm:$0xf] %vm241_vm0, %v235_v16 }
  0x92   : > { %240 = vst [vmem:[%s208_s26] sm:$0xff] %v238_v17 }
  0x93 PF: > { %s13_s14 = sadd.s32 1, %s389_s14   ;;  %s455_s12 = smov %s385_s13 }
  0x94   : > { %p10_p5 = scmp.ge.s32.totalorder %s13_s14, 4   ;;  %s456_s13 = smov %s458_s15 }
  0x96   :  { %12 = sbr.rel (!%p10_p5) target bundleno = 2 (0x2), region = 62 }

// kernel: up_forward.5
= control target key start
LH: loop header
LB: loop body
LE: loop exit
PB: predicated region body
PF: predicated region fallthrough
CT: control target
= control target key end

     0   :  { %s1281_s18 = smov 0   ;;  %s1429_s0 = inlined_call_operand.vmem [shape: bf16[2,4,342], index: 0, kind: input, shape index: {}]   ;;  %s1430_s1 = inlined_call_operand.vmem [shape: bf16[2,4,342], index: 1, kind: input, shape index: {}]   ;;  %s1431_s2 = inlined_call_operand.vmem [shape: bf16[4,72], index: 2, kind: input, shape index: {}]   ;;  %s1432_s3 = inlined_call_operand.vmem [shape: f32[1,288], index: 3, kind: input, shape index: {}]   ;;  %s1433_s4 = inlined_call_operand.vmem [shape: f32[2,4,342], index: 4, kind: output, shape index: {0}]   ;;  %s1434_s5 = inlined_call_operand.vmem [shape: f32[2,4,2], index: 5, kind: output, shape index: {1}]  }
   0x1 LB: > { %s1123_s19 = sadd.s32 4294967295, %s1236_s18   ;;  %p1127_p0 = scmp.ge.s32.totalorder %s1236_s18, 1  ;;  %s1236_s18 = sphi %s1281_s18, %s16_s18  }
   0x2   : > { %p200_p1 = scmp.lt.s32.totalorder %s1236_s18, 3 }
   0x4   : > { %p201_p2 = pnand %p1127_p0, %p200_p1 }
   0x5   : > { %p237_p3 = scmp.lt.s32.totalorder (!%p201_p2), %s1123_s19, 1  ;;  %v270_v0 = vlaneseq (!%p201_p2)  ;;  %v1238_v1 = vmov (!%p201_p2), 1983009808   ;;  %s1239_s27 = smov (!%p201_p2), 127   ;;  %vm299_vm0 = vcmask (!%p201_p2), 257026   ;;  %vm277_vm1 = vcmask (!%p201_p2), 254976  }
   0x6   : > { %204 = sbr.rel (%p201_p2) target bundleno = 585 (0x249), region = 36  ;;  %v268_v2 = vunpack.c.l.s4 (!%p201_p2), %v1238_v1  ;;  %s1240_s28 = smov (!%p201_p2), 126   ;;  %v1241_v30 = vmov (!%p201_p2), 0.0   ;;  %vm1249_vm2 = vmmov (!%p201_p2), 0   ;;  %vm324_vm3 = vcmask (!%p201_p2), 1043456  }
   0x7   : > { %v1291_v3 = vshrl.u32 (!%p201_p2), %v270_v0, 7  ;;  %1160 = vmatprep.subr.bf16.mxu1 (!%p201_p2), %v1241_v30  ;;  %s1242_s29 = smov (!%p201_p2), 110   ;;  %s1243_s30 = smov (!%p201_p2), 109   ;;  %1170 = vmatprep.mubr.msk.bf16.mxu1 (!%p201_p2), %vm1249_vm2, %v1241_v30  ;;  %vm326_vm4 = vcmask (!%p201_p2), 1039360   ;;  %vm385_vm5 = vcmask (!%p201_p2), 1031168   ;;  %vm444_vm6 = vcmask (!%p201_p2), 900096  }
   0x8   : > { %v269_v4 = vunpack.c.0.s8 (!%p201_p2), %v268_v2  ;;  %s1244_s6 = smov (!%p201_p2), 108   ;;  %s1245_s7 = smov (!%p201_p2), 92   ;;  %vm503_vm7 = vcmask (!%p201_p2), 891904   ;;  %vm562_vm8 = vcmask (!%p201_p2), 883712   ;;  %vm621_vm9 = vcmask (!%p201_p2), 752640  }
   0x9   : > { %s1246_s8 = smov (!%p201_p2), 91   ;;  %s1247_s9 = smov (!%p201_p2), 90   ;;  %vm680_vm10 = vcmask (!%p201_p2), 744448   ;;  %vm739_vm11 = vcmask (!%p201_p2), 736256   ;;  %vm865_vm12 = vcmask (!%p201_p2), 588800   ;;  %vm983_vm13 = vcmask (!%p201_p2), 257024  }
   0xa   : > { %v1295_v5 = vsub.s32 (!%p201_p2), %v269_v4, %v1291_v3  ;;  %vm1003_vm14 = vcmask (!%p201_p2), 699392   ;;  %vm988_vm15 = vcmask (!%p201_p2), 3072   ;;  %vm1020_vm2 = vcmask (!%p201_p2), 1047556  }
   0xd   : > { %s1436_s19 = smov (!%p237_p3, %s1123_s19), 1 }
   0xe   : > { %s1174_s20 = smul.u32 6, %s1436_s19  ;;  %s1131_s21 = sshll.u32 %s1436_s19, 2 }
   0xf   : > { %s1175_s14 = smul.u32 12, %s1436_s19  ;;  %s255_s24 = scalar_lea.vmem %s1434_s5, %s1131_s21 }
  0x10   : > { %s1300_s23 = scalar_lea.vmem %s1430_s1, %s1174_s20  ;;  %s1305_s26 = scalar_lea.vmem %s1429_s0, %s1174_s20 }
  0x11   : > { %v332_v6 = vld [vmem:[%s1300_s23] sm:$0x3f]  ;;  %s251_s17 = scalar_lea.vmem %s1433_s4, %s1175_s14  ;;  %s1250_s20 = smov 19  }
  0x12   : > { %v301_v7 = vld [vmem:[%s1305_s26] sm:$0x3f]  ;;  %v348_v9 = vrot.slane %v332_v6, %v1295_v5  ;;  %v334_v12 = vcombine.low %v332_v6, %v332_v6  ;;  %1002 = vst [vmem:[%s251_s17] sm:$0xff] %v1241_v30  ;;  %1004 = vst.msk [vmem:[%s251_s17 + $0x8] sm:$0xf] %vm1003_vm14, %v1241_v30 }
  0x13   : > { %v391_v8 = vld [vmem:[%s1300_s23] sm:$0x3f]  ;;  %v310_v10 = vrot.slane %v301_v7, %v1295_v5  ;;  %v303_v13 = vcombine.high %v301_v7, %v301_v7 }
  0x14   : > { %v361_v11 = vld [vmem:[%s1305_s26] sm:$0x3f]  ;;  %351 = vrot.lane.b32.xlu1 %v348_v9, %s1239_s27  ;;  %v407_v14 = vrot.slane %v391_v8, %v1295_v5  ;;  %v341_v18 = vrot.slane %v334_v12, %v1295_v5  ;;  %v393_v20 = vcombine.low %v391_v8, %v391_v8 }
  0x15   : > { %318 = vrot.lane.b32.xlu0 %v310_v10, %s1239_s27  ;;  %v370_v15 = vrot.slane %v361_v11, %v1295_v5  ;;  %v257_v16 = vld [vmem:[%s1305_s26] sm:$0x3f]  ;;  %v363_v17 = vcombine.high %v361_v11, %v361_v11  ;;  %v317_v19 = vrot.slane %v303_v13, %v1295_v5 }
  0x16   : > { %1132 = vst.sshfl [vmem:[#allocation2] sm:$0xf pattern:$0x76325410] %v257_v16  ;;  %v420_v21 = vld [vmem:[%s1305_s26] sm:$0x3f]  ;;  %v400_v24 = vrot.slane %v393_v20, %v1295_v5  ;;  %v259_v27 = vcombine.high %v257_v16, %v257_v16 }
  0x17   : > { %v279_v22 = vld [vmem:[%s1300_s23] sm:$0x3f]  ;;  %v377_v23 = vrot.slane %v363_v17, %v1295_v5  ;;  %v422_v25 = vcombine.high %v420_v21, %v420_v21  ;;  %v429_v29 = vrot.slane %v420_v21, %v1295_v5 }
  0x18   : > { %410 = vrot.lane.b32.xlu1 %v407_v14, %s1240_s28  ;;  %v450_v26 = vld [vmem:[%s1300_s23] sm:$0x3f]  ;;  %v295_v28 = vrot.slane %v279_v22, %v1295_v5  ;;  %v281_v31 = vcombine.low %v279_v22, %v279_v22  ;;  %v273_v34 = vrot.slane %v259_v27, %v1295_v5 }
  0x19   : > { %378 = vrot.lane.b32.xlu0 %v370_v15, %s1240_s28  ;;  %v436_v32 = vrot.slane %v422_v25, %v1295_v5  ;;  %v452_v33 = vcombine.low %v450_v26, %v450_v26  ;;  %v479_v35 = vld [vmem:[%s1305_s26] sm:$0x3f]  ;;  %v466_v36 = vrot.slane %v450_v26, %v1295_v5  ;;  %v1248_v15 = vmov 0  }
  0x1a   : > { %300 = vst.msk [vmem:[#allocation2 + $0x8] sm:$0xc] %vm299_vm0, %v295_v28  ;;  %1133 = vst.sshfl [vmem:[#allocation2] sm:$0xf0 pattern:$0x76325410] %v281_v31  ;;  %v481_v38 = vcombine.high %v479_v35, %v479_v35  ;;  %v488_v41 = vrot.slane %v479_v35, %v1295_v5  ;;  %911 = vmatprep.mubr.bf16.mxu0 %v1248_v15 }
  0x1b   : > { %278 = vst.msk [vmem:[#allocation2 + $0x8] sm:$0x3] %vm277_vm1, %v273_v34  ;;  %v459_v37 = vrot.slane %v452_v33, %v1295_v5  ;;  %v509_v39 = vld [vmem:[%s1300_s23] sm:$0x3f] }
  0x1c   : > { %349 = vrot.lane.b32.xlu1 %v341_v18, %s1239_s27  ;;  %v495_v40 = vrot.slane %v481_v38, %v1295_v5  ;;  %v511_v42 = vcombine.low %v509_v39, %v509_v39  ;;  %v538_v43 = vld [vmem:[%s1305_s26] sm:$0x3f]  ;;  %v525_v44 = vrot.slane %v509_v39, %v1295_v5 }
  0x1d   : > { %320 = vrot.lane.b32.xlu0 %v317_v19, %s1239_s27  ;;  %v540_v46 = vcombine.high %v538_v43, %v538_v43  ;;  %v568_v47 = vld [vmem:[%s1300_s23] sm:$0x3f]  ;;  %v547_v49 = vrot.slane %v538_v43, %v1295_v5 }
  0x1e   : > { %v518_v45 = vrot.slane %v511_v42, %v1295_v5  ;;  %v570_v50 = vcombine.low %v568_v47, %v568_v47  ;;  %v597_v51 = vld [vmem:[%s1305_s26] sm:$0x3f]  ;;  %v584_v52 = vrot.slane %v568_v47, %v1295_v5 }
  0x1f   : > { %v554_v48 = vrot.slane %v540_v46, %v1295_v5  ;;  %v599_v54 = vcombine.high %v597_v51, %v597_v51  ;;  %v627_v55 = vld [vmem:[%s1300_s23] sm:$0x3f]  ;;  %v606_v57 = vrot.slane %v597_v51, %v1295_v5 }
  0x20   : > { %380 = vrot.lane.b32.xlu1 %v377_v23, %s1240_s28  ;;  %v577_v53 = vrot.slane %v570_v50, %v1295_v5  ;;  %v629_v58 = vcombine.low %v627_v55, %v627_v55  ;;  %v656_v59 = vld [vmem:[%s1305_s26] sm:$0x3f]  ;;  %v643_v60 = vrot.slane %v627_v55, %v1295_v5 }
  0x21   : > { %408 = vrot.lane.b32.xlu0 %v400_v24, %s1240_s28  ;;  %v613_v56 = vrot.slane %v599_v54, %v1295_v5  ;;  %v658_v62 = vcombine.high %v656_v59, %v656_v59  ;;  %v686_v63 = vld [vmem:[%s1300_s23] sm:$0x3f]  ;;  %v665_v1 = vrot.slane %v656_v59, %v1295_v5 }
  0x22   : > { %v636_v61 = vrot.slane %v629_v58, %v1295_v5  ;;  %v688_v2 = vcombine.low %v686_v63, %v686_v63  ;;  %v715_v4 = vld [vmem:[%s1305_s26] sm:$0x3f]  ;;  %v702_v6 = vrot.slane %v686_v63, %v1295_v5 }
  0x23   : > { %v672_v0 = vrot.slane %v658_v62, %v1295_v5  ;;  %v717_v8 = vcombine.high %v715_v4, %v715_v4  ;;  %v745_v9 = vld [vmem:[%s1300_s23] sm:$0x3f]  ;;  %v724_v11 = vrot.slane %v715_v4, %v1295_v5 }
  0x24   : > { %439 = vrot.lane.b32.xlu1 %v436_v32, %s1242_s29  ;;  %v695_v7 = vrot.slane %v688_v2, %v1295_v5  ;;  %v747_v12 = vcombine.low %v745_v9, %v745_v9  ;;  %v761_v13 = vrot.slane %v745_v9, %v1295_v5 }
  0x25   : > { %437 = vrot.lane.b32.xlu0 %v429_v29, %s1242_s29  ;;  %v731_v10 = vrot.slane %v717_v8, %v1295_v5 }
  0x26   : > { %v754_v14 = vrot.slane %v747_v12, %v1295_v5 }
  0x28   : > { %469 = vrot.lane.b32.xlu1 %v466_v36, %s1242_s29 }
  0x29   : > { %467 = vrot.lane.b32.xlu0 %v459_v37, %s1242_s29 }
  0x2c   : > { %498 = vrot.lane.b32.xlu1 %v495_v40, %s1243_s30 }
  0x2d   : > { %496 = vrot.lane.b32.xlu0 %v488_v41, %s1243_s30 }
  0x30   : > { %528 = vrot.lane.b32.xlu1 %v525_v44, %s1243_s30 }
  0x31   : > { %526 = vrot.lane.b32.xlu0 %v518_v45, %s1243_s30  ;;  %v775_v45 = vld [vmem:[#allocation2] sm:$0xff] }
  0x34   : > { %557 = vrot.lane.b32.xlu1 %v554_v48, %s1244_s6 }
  0x35   : > { %555 = vrot.lane.b32.xlu0 %v547_v49, %s1244_s6 }
  0x38   : > { %587 = vrot.lane.b32.xlu1 %v584_v52, %s1244_s6 }
  0x39   : > { %585 = vrot.lane.b32.xlu0 %v577_v53, %s1244_s6 }
  0x3c   : > { %616 = vrot.lane.b32.xlu1 %v613_v56, %s1245_s7 }
  0x3d   : > { %614 = vrot.lane.b32.xlu0 %v606_v57, %s1245_s7 }
  0x40   : > { %646 = vrot.lane.b32.xlu1 %v643_v60, %s1245_s7 }
  0x41   : > { %644 = vrot.lane.b32.xlu0 %v636_v61, %s1245_s7 }
  0x44   : > { %675 = vrot.lane.b32.xlu1 %v672_v0, %s1246_s8 }
  0x45   : > { %673 = vrot.lane.b32.xlu0 %v665_v1, %s1246_s8 }
  0x48   : > { %705 = vrot.lane.b32.xlu1 %v702_v6, %s1246_s8 }
  0x49   : > { %703 = vrot.lane.b32.xlu0 %v695_v7, %s1246_s8 }
  0x4c   : > { %734 = vrot.lane.b32.xlu1 %v731_v10, %s1247_s9 }
  0x4d   : > { %732 = vrot.lane.b32.xlu0 %v724_v11, %s1247_s9 }
  0x50   : > { %764 = vrot.lane.b32.xlu1 %v761_v13, %s1247_s9 }
  0x51   : > { %762 = vrot.lane.b32.xlu0 %v754_v14, %s1247_s9 }
  0x86   : > { %v352_v16 = vpop.permute.xlu1 %351 }
  0x87   : > { %v319_v17 = vpop.permute.xlu0 %318  ;;  %360 = vst.msk [vmem:[#allocation2 + $0x14] sm:$0xc] %vm299_vm0, %v352_v16  ;;  %v354_v5 = vrot.slane %v352_v16, 4 }
  0x88   : > { %v322_v22 = vrot.slane %v319_v17, 4 }
  0x8a   : > { %v411_v18 = vpop.permute.xlu1 %410 }
  0x8b   : > { %v379_v19 = vpop.permute.xlu0 %378  ;;  %419 = vst.msk [vmem:[#allocation2 + $0x20] sm:$0xc] %vm299_vm0, %v411_v18  ;;  %v413_v32 = vrot.slane %v411_v18, 4 }
  0x8c   : > { %v382_v33 = vrot.slane %v379_v19, 4 }
  0x8e   : > { %v350_v20 = vpop.permute.xlu1 %349 }
  0x8f   : > { %v321_v21 = vpop.permute.xlu0 %320  ;;  %v353_v23 = vrot.slane %v350_v20, 4 }
  0x90   : > { %v323_v24 = vrot.slane %v321_v21, 4  ;;  %331 = vst.msk [vmem:[#allocation2 + $0x14] sm:$0x3] %vm277_vm1, %v321_v21 }
  0x91   : > { %v355_v25 = vsel %vm324_vm3, %v353_v23, %v354_v5 }
  0x92   : > { %v325_v26 = vsel %vm324_vm3, %v322_v22, %v323_v24  ;;  %v356_v27 = vsel %vm326_vm4, %v350_v20, %v355_v25  ;;  %v381_v29 = vpop.permute.xlu1 %380 }
  0x93   : > { %v327_v28 = vsel %vm326_vm4, %v319_v17, %v325_v26  ;;  %v409_v31 = vpop.permute.xlu0 %408  ;;  %359 = vst [vmem:[#allocation2 + $0xc] sm:$0xcc] %v356_v27  ;;  %v383_v34 = vrot.slane %v381_v29, 4  ;;  %390 = vst.msk [vmem:[#allocation2 + $0x20] sm:$0x3] %vm277_vm1, %v381_v29 }
  0x94   : > { %330 = vst [vmem:[#allocation2 + $0xc] sm:$0x33] %v327_v28  ;;  %v412_v35 = vrot.slane %v409_v31, 4 }
  0x95   : > { %v384_v36 = vsel %vm324_vm3, %v382_v33, %v383_v34 }
  0x96   : > { %v414_v37 = vsel %vm324_vm3, %v412_v35, %v413_v32  ;;  %v386_v38 = vsel %vm385_vm5, %v379_v19, %v384_v36  ;;  %v440_v40 = vpop.permute.xlu1 %439 }
  0x97   : > { %v415_v39 = vsel %vm385_vm5, %v409_v31, %v414_v37  ;;  %v438_v41 = vpop.permute.xlu0 %437  ;;  %v1214_v42 = vld [vmem:[#allocation2 + $0x8] ss:$12 sps:$4 sm:$0xff]   ;;  %389 = vst [vmem:[#allocation2 + $0x18] sm:$0x33] %v386_v38  ;;  %v442_v43 = vrot.slane %v440_v40, 4  ;;  %vm1023_vm5 = vcmask 412672  }
  0x98   : > { %418 = vst [vmem:[#allocation2 + $0x18] sm:$0xcc] %v415_v39  ;;  %449 = vst.msk [vmem:[#allocation2 + $0x2c] sm:$0x3] %vm277_vm1, %v440_v40  ;;  %v441_v44 = vrot.slane %v438_v41, 4  ;;  %1161 = vmatpush3.bf16.msra.mxu1 %v1214_v42 }
  0x99   : > { %1162 = vmatprep.subr.bf16.mxu1 %v1241_v30 }
  0x9a   : > { %v443_v46 = vsel %vm324_vm3, %v441_v44, %v442_v43  ;;  %v470_v48 = vpop.permute.xlu1 %469 }
  0x9b   : > { %v445_v47 = vsel %vm444_vm6, %v438_v41, %v443_v46  ;;  %v468_v49 = vpop.permute.xlu0 %467  ;;  %v777_v50 = vld [vmem:[#allocation2 + $0xc] sm:$0xff]  ;;  %v472_v52 = vrot.slane %v470_v48, 4  ;;  %478 = vst.msk [vmem:[#allocation2 + $0x2c] sm:$0xc] %vm299_vm0, %v470_v48 }
  0x9c   : > { %v1215_v51 = vld [vmem:[#allocation2 + $0x4] ss:$12 sps:$4 sm:$0xff]   ;;  %448 = vst [vmem:[#allocation2 + $0x24] sm:$0x33] %v445_v47  ;;  %v471_v53 = vrot.slane %v468_v49, 4  ;;  %v1134_v54 = vcombine.low %v775_v45, %v777_v50 }
  0x9d   : > { %879 = vmatprep.subr.bf16.mxu0 %v1215_v51 }
  0x9e   : > { %v473_v55 = vsel %vm324_vm3, %v471_v53, %v472_v52  ;;  %880 = vmatpush1.bf16.msra.mxu0 %v1134_v54  ;;  %v499_v57 = vpop.permute.xlu1 %498 }
  0x9f   : > { %v474_v56 = vsel %vm444_vm6, %v468_v49, %v473_v55  ;;  %v497_v58 = vpop.permute.xlu0 %496  ;;  %v501_v59 = vrot.slane %v499_v57, 4  ;;  %508 = vst.msk [vmem:[#allocation2 + $0x38] sm:$0x3] %vm277_vm1, %v499_v57  ;;  %v779_v10 = vld [vmem:[#allocation2 + $0x18] sm:$0xff] }
  0xa0   : > { %477 = vst [vmem:[#allocation2 + $0x24] sm:$0xcc] %v474_v56  ;;  %v500_v60 = vrot.slane %v497_v58, 4 }
  0xa2   : > { %v502_v61 = vsel %vm324_vm3, %v500_v60, %v501_v59  ;;  %v529_v63 = vpop.permute.xlu1 %528  ;;  %v1217_v1 = vld [vmem:[#allocation2 + $0x20] ss:$12 sps:$4 sm:$0xff]  }
  0xa3   : > { %v504_v62 = vsel %vm503_vm7, %v497_v58, %v502_v61  ;;  %v527_v0 = vpop.permute.xlu0 %526  ;;  %v531_v2 = vrot.slane %v529_v63, 4  ;;  %537 = vst.msk [vmem:[#allocation2 + $0x38] sm:$0xc] %vm299_vm0, %v529_v63  ;;  %1163 = vmatpush3.bf16.msra.mxu1 %v1217_v1 }
  0xa4   : > { %507 = vst [vmem:[#allocation2 + $0x30] sm:$0x33] %v504_v62  ;;  %v530_v4 = vrot.slane %v527_v0, 4  ;;  %1164 = vmatprep.subr.bf16.mxu1 %v1241_v30 }
  0xa6   : > { %v532_v6 = vsel %vm324_vm3, %v530_v4, %v531_v2  ;;  %v558_v8 = vpop.permute.xlu1 %557 }
  0xa7   : > { %v533_v7 = vsel %vm503_vm7, %v527_v0, %v532_v6  ;;  %v556_v9 = vpop.permute.xlu0 %555  ;;  %v781_v11 = vld [vmem:[#allocation2 + $0x24] sm:$0xff]  ;;  %v560_v13 = vrot.slane %v558_v8, 4  ;;  %567 = vst.msk [vmem:[#allocation2 + $0x44] sm:$0x3] %vm277_vm1, %v558_v8  ;;  %v774_v8 = vld [vmem:[%s1431_s2] sm:$0x3] }
  0xa8   : > { %v1218_v12 = vld [vmem:[#allocation2 + $0x1c] ss:$12 sps:$4 sm:$0xff]   ;;  %536 = vst [vmem:[#allocation2 + $0x30] sm:$0xcc] %v533_v7  ;;  %v559_v14 = vrot.slane %v556_v9, 4  ;;  %v1137_v15 = vcombine.low %v779_v10, %v781_v11 }
  0xa9   : > { %881 = vmatprep.subr.bf16.mxu0 %v1218_v12 }
  0xaa   : > { %v561_v16 = vsel %vm324_vm3, %v559_v14, %v560_v13  ;;  %882 = vmatpush1.bf16.msra.mxu0 %v1137_v15  ;;  %v588_v18 = vpop.permute.xlu1 %587  ;;  %v972_v13 = vsub.s32 2, %v1291_v3  ;;  %v960_v14 = vld [vmem:[%s1432_s3] sm:$0x7]  ;;  %v964_v15 = vsub.s32 0, %v1291_v3 }
  0xab   : > { %v563_v17 = vsel %vm562_vm8, %v556_v9, %v561_v16  ;;  %v586_v19 = vpop.permute.xlu0 %585  ;;  %v590_v20 = vrot.slane %v588_v18, 4  ;;  %596 = vst.msk [vmem:[#allocation2 + $0x44] sm:$0xc] %vm299_vm0, %v588_v18 }
  0xac   : > { %566 = vst [vmem:[#allocation2 + $0x3c] sm:$0x33] %v563_v17  ;;  %v589_v21 = vrot.slane %v586_v19, 4  ;;  %v973_v16 = vrot.slane %v960_v14, %v972_v13  ;;  %v968_v17 = vsub.s32 1, %v1291_v3 }
  0xae   : > { %v591_v5 = vsel %vm324_vm3, %v589_v21, %v590_v20  ;;  %v617_v23 = vpop.permute.xlu1 %616  ;;  %v965_v20 = vrot.slane %v960_v14, %v964_v15 }
  0xaf   : > { %v592_v22 = vsel %vm562_vm8, %v586_v19, %v591_v5  ;;  %v615_v24 = vpop.permute.xlu0 %614  ;;  %v619_v25 = vrot.slane %v617_v23, 4  ;;  %626 = vst.msk [vmem:[#allocation2 + $0x50] sm:$0x3] %vm277_vm1, %v617_v23  ;;  %v783_v39 = vld [vmem:[#allocation2 + $0x30] sm:$0xff] }
  0xb0   : > { %595 = vst [vmem:[#allocation2 + $0x3c] sm:$0xcc] %v592_v22  ;;  %v618_v26 = vrot.slane %v615_v24, 4  ;;  %v969_v22 = vrot.slane %v960_v14, %v968_v17 }
  0xb2   : > { %v620_v27 = vsel %vm324_vm3, %v618_v26, %v619_v25  ;;  %v647_v29 = vpop.permute.xlu1 %646  ;;  %v1220_v32 = vld [vmem:[#allocation2 + $0x38] ss:$12 sps:$4 sm:$0xff]  }
  0xb3   : > { %v622_v28 = vsel %vm621_vm9, %v615_v24, %v620_v27  ;;  %v645_v31 = vpop.permute.xlu0 %644  ;;  %v649_v33 = vrot.slane %v647_v29, 4  ;;  %655 = vst.msk [vmem:[#allocation2 + $0x50] sm:$0xc] %vm299_vm0, %v647_v29  ;;  %1165 = vmatpush3.bf16.msra.mxu1 %v1220_v32 }
  0xb4   : > { %625 = vst [vmem:[#allocation2 + $0x48] sm:$0x33] %v622_v28  ;;  %v648_v34 = vrot.slane %v645_v31, 4  ;;  %1166 = vmatprep.subr.bf16.mxu1 %v1241_v30 }
  0xb6   : > { %v650_v35 = vsel %vm324_vm3, %v648_v34, %v649_v33  ;;  %v676_v37 = vpop.permute.xlu1 %675 }
  0xb7   : > { %v651_v36 = vsel %vm621_vm9, %v645_v31, %v650_v35  ;;  %v674_v38 = vpop.permute.xlu0 %673  ;;  %v785_v40 = vld [vmem:[#allocation2 + $0x3c] sm:$0xff]  ;;  %v678_v42 = vrot.slane %v676_v37, 4  ;;  %685 = vst.msk [vmem:[#allocation2 + $0x5c] sm:$0x3] %vm277_vm1, %v676_v37 }
  0xb8   : > { %v1221_v41 = vld [vmem:[#allocation2 + $0x34] ss:$12 sps:$4 sm:$0xff]   ;;  %654 = vst [vmem:[#allocation2 + $0x48] sm:$0xcc] %v651_v36  ;;  %v677_v43 = vrot.slane %v674_v38, 4  ;;  %v1140_v44 = vcombine.low %v783_v39, %v785_v40 }
  0xb9   : > { %883 = vmatprep.subr.bf16.mxu0 %v1221_v41 }
  0xba   : > { %v679_v45 = vsel %vm324_vm3, %v677_v43, %v678_v42  ;;  %884 = vmatpush1.bf16.msra.mxu0 %v1140_v44  ;;  %v706_v47 = vpop.permute.xlu1 %705 }
  0xbb   : > { %v681_v46 = vsel %vm680_vm10, %v674_v38, %v679_v45  ;;  %v704_v48 = vpop.permute.xlu0 %703  ;;  %v708_v49 = vrot.slane %v706_v47, 4  ;;  %714 = vst.msk [vmem:[#allocation2 + $0x5c] sm:$0xc] %vm299_vm0, %v706_v47  ;;  %vm1000_vm0 = vcmask 11272  }
  0xbc   : > { %684 = vst [vmem:[#allocation2 + $0x54] sm:$0x33] %v681_v46  ;;  %v707_v50 = vrot.slane %v704_v48, 4 }
  0xbe   : > { %v709_v51 = vsel %vm324_vm3, %v707_v50, %v708_v49  ;;  %v735_v53 = vpop.permute.xlu1 %734 }
  0xbf   : > { %v710_v52 = vsel %vm680_vm10, %v704_v48, %v709_v51  ;;  %v733_v54 = vpop.permute.xlu0 %732  ;;  %v737_v55 = vrot.slane %v735_v53, 4  ;;  %744 = vst.msk [vmem:[#allocation2 + $0x68] sm:$0x3] %vm277_vm1, %v735_v53  ;;  %vm1019_vm1 = vcmask 1043608  }
  0xc0   : > { %713 = vst [vmem:[#allocation2 + $0x54] sm:$0xcc] %v710_v52  ;;  %v736_v56 = vrot.slane %v733_v54, 4  ;;  %vm1021_vm4 = vmor %vm1020_vm2, %vm1019_vm1 }
  0xc2   : > { %v738_v57 = vsel %vm324_vm3, %v736_v56, %v737_v55  ;;  %v765_v59 = vpop.permute.xlu1 %764  ;;  %v1223_v61 = vld [vmem:[#allocation2 + $0x50] ss:$12 sps:$4 sm:$0xff]  }
  0xc3   : > { %v740_v58 = vsel %vm739_vm11, %v733_v54, %v738_v57  ;;  %v763_v60 = vpop.permute.xlu0 %762  ;;  %v767_v62 = vrot.slane %v765_v59, 4  ;;  %1167 = vmatpush3.bf16.msra.mxu1 %v1223_v61 }
  0xc4   : > { %743 = vst [vmem:[#allocation2 + $0x60] sm:$0x33] %v740_v58  ;;  %v766_v63 = vrot.slane %v763_v60, 4  ;;  %1168 = vmatprep.subr.bf16.mxu1 %v1241_v30 }
  0xc6   : > { %v768_v0 = vsel %vm324_vm3, %v766_v63, %v767_v62  ;;  %v1227_v6 = vld [vmem:[#allocation2 + $0x68] ss:$0 sps:$4 sm:$0xff]  }
  0xc7   : > { %v769_v1 = vsel %vm739_vm11, %v763_v60, %v768_v0  ;;  %v1224_v2 = vld [vmem:[#allocation2 + $0x4c] ss:$12 sps:$4 sm:$0xff]   ;;  %v1226_v4 = vld [vmem:[#allocation2 + $0x48] ss:$12 sps:$4 sm:$0xff]   ;;  %v877_v7 = vsel %vm324_vm3, %v1227_v6, 0 }
  0xc8   : > { %772 = vst [vmem:[#allocation2 + $0x60] sm:$0xcc] %v769_v1  ;;  %885 = vmatprep.subr.bf16.mxu0 %v1224_v2  ;;  %1169 = vmatpush3.bf16.msra.mxu1 %v877_v7 }
  0xc9   : > { %886 = vmatpush1.bf16.msra.mxu0 %v1226_v4 }
  0xcb   : > { %1171 = vmatmul.mubr.msk.bf16.vlgmr.msra.gmra.mrb[0].mxu1 %vm865_vm12, %v774_v8 }
  0xcf   : > { %v791_v9 = vld [vmem:[#allocation2 + $0x60] sm:$0xff] }
  0xd0   : > { %v1147_v10 = vcombine.high %v791_v9, %v791_v9  ;;  %v1146_v11 = vcombine.low %v791_v9, %v791_v9 }
  0xd2   : > { %1149 = vmatprep.subr.msk.bf16.mxu0 %vm324_vm3, %v1147_v10  ;;  %v871_v12 = vsel %vm324_vm3, %v1146_v11, 0 }
  0xd3   : > { %888 = vmatpush1.bf16.msra.mxu0 %v871_v12 }
  0xd6   : > { %1150 = vmatmul.mubr.msk.bf16.vlgmr.msra.gmra.mrb[0].mxu0 %vm865_vm12, %v774_v8 }
 0x19e   : > { %v954_v18 = vpop.f32.mrb[0].mxu1 }
 0x19f   : > { %v1172_v19 = vpop.f32.mrb[1].mxu1  ;;  %v979_v5 = vmul.f32 %v973_v16, %v954_v18 }
 0x1a0   : > { %v957_v21 = vpop.f32.mrb[2].mxu1 }
 0x1a1   : > { %v1173_v23 = vpop.f32.mrb[3].mxu1  ;;  %v992_v27 = vmul.f32 %v979_v5, %v979_v5  ;;  %v984_v36 = vsel %vm983_vm13, %v979_v5, 0.0 }
 0x1a3   : > { %v996_v40 = vsel %vm983_vm13, %v992_v27, 0.0 }
 0x1a9   : > { %v913_v24 = vpop.f32.mrb[0].mxu0 }
 0x1aa   : > { %v977_v25 = vmul.f32 %v965_v20, %v913_v24  ;;  %v915_v26 = vpop.f32.mrb[1].mxu0 }
 0x1ab   : > { %v978_v28 = vmul.f32 %v969_v22, %v915_v26  ;;  %v1008_v29 = vcombine.low %v913_v24, %v915_v26  ;;  %v917_v31 = vpop.f32.mrb[2].mxu0 }
 0x1ac   : > { %v980_v32 = vsel %vm324_vm3, %v977_v25, 0.0  ;;  %v990_v33 = vmul.f32 %v977_v25, %v977_v25  ;;  %v918_v3 = vpop.f32.mrb[3].mxu0 }
 0x1ad   : > { %v981_v34 = vsel %vm324_vm3, %v978_v28, 0.0  ;;  %v991_v35 = vmul.f32 %v978_v28, %v978_v28 }
 0x1ae   : > { %v982_v37 = vadd.f32 %v981_v34, %v980_v32  ;;  %v993_v38 = vsel %vm324_vm3, %v990_v33, 0.0 }
 0x1af   : > { %v994_v39 = vsel %vm324_vm3, %v991_v35, 0.0  ;;  %vm1014_vm3 = vcmask 154624  }
 0x1b0   : > { %v985_v41 = vadd.f32 %v984_v36, %v982_v37  ;;  %v995_v42 = vadd.f32 %v994_v39, %v993_v38 }
 0x1b2   : > { %986 = vadd.xlane.f32.xlu0 %v985_v41  ;;  %v997_v43 = vadd.f32 %v996_v40, %v995_v42 }
 0x1b4   : > { %998 = vadd.xlane.f32.xlu1 %v997_v43 }
 0x1c5   : > { %1011 = vrot.lane.b32.xlu1 %v954_v18, %s1250_s20 }
 0x1c8   : > { %1009 = vrot.lane.b32.xlu0 %v1008_v29, %s1250_s20 }
 0x23f   : > { %v987_v44 = vpop.xlane.xlu0 %986 }
 0x240   : > { %989 = vst.msk [vmem:[%s255_s24] sm:$0xf] %vm988_vm15, %v987_v44 }
 0x241   : > { %v999_v45 = vpop.xlane.xlu1 %998 }
 0x242   : > { %1001 = vst.msk [vmem:[%s255_s24] sm:$0xf] %vm1000_vm0, %v999_v45 }
 0x243   : > { %v1010_v46 = vpop.permute.xlu0 %1009 }
 0x244   : > { %v1013_v47 = vrot.slane %v1010_v46, 4 }
 0x245   : > { %v1012_v30 = vpop.permute.xlu1 %1011 }
 0x246   : > { %v1015_v48 = vsel %vm1014_vm3, %v1013_v47, %v1010_v46  ;;  %v1016_v49 = vsel %vm1014_vm3, %v1013_v47, %v1012_v30 }
 0x247   : > { %1022 = vst.msk [vmem:[%s251_s17] sm:$0xff] %vm1021_vm4, %v1015_v48 }
 0x248   : > { %1024 = vst.msk [vmem:[%s251_s17 + $0x8] sm:$0xf] %vm1023_vm5, %v1016_v49 }
 0x249 PF: > { %s16_s18 = sadd.s32 1, %s1236_s18  }
 0x24a   : > { %p13_p4 = scmp.ge.s32.totalorder %s16_s18, 4  }
 0x24c   :  { %15 = sbr.rel (!%p13_p4) target bundleno = 1 (0x1), region = 81 }

// kernel: up_forward.6
= control target key start
LH: loop header
LB: loop body
LE: loop exit
PB: predicated region body
PF: predicated region fallthrough
CT: control target
= control target key end

     0   :  { %s1070_s24 = smov 0   ;;  %s1197_s0 = inlined_call_operand.vmem [shape: f32[2,4,342], index: 0, kind: input, shape index: {}]   ;;  %s1198_s1 = inlined_call_operand.vmem [shape: f32[4,1], index: 1, kind: input, shape index: {}]   ;;  %s1199_s2 = inlined_call_operand.vmem [shape: f32[4,1], index: 2, kind: input, shape index: {}]   ;;  %s1200_s3 = inlined_call_operand.vmem [shape: f32[1,342], index: 3, kind: input, shape index: {}]   ;;  %s1201_s4 = inlined_call_operand.vmem [shape: bf16[4,36], index: 4, kind: input, shape index: {}]   ;;  %s1202_s5 = inlined_call_operand.vmem [shape: f32[1,288], index: 5, kind: input, shape index: {}]   ;;  %s1203_s6 = inlined_call_operand.vmem [shape: f32[2,4,342], index: 6, kind: output, shape index: {0}]   ;;  %s1204_s7 = inlined_call_operand.vmem [shape: f32[2,4,2], index: 7, kind: output, shape index: {1}]  }
   0x1 LB: > { %s927_s25 = sadd.s32 4294967295, %s1015_s24   ;;  %p931_p0 = scmp.ge.s32.totalorder %s1015_s24, 1  ;;  %s1015_s24 = sphi %s1070_s24, %s18_s24  }
   0x2   : > { %p240_p1 = scmp.lt.s32.totalorder %s1015_s24, 3 }
   0x4   : > { %p241_p2 = pnand %p931_p0, %p240_p1 }
   0x5   : > { %v291_v0 = vld [vmem:[%s1198_s1] sm:$0xf] (!%p241_p2)  ;;  %v1017_v1 = vmov (!%p241_p2), 0   ;;  %p276_p3 = scmp.lt.s32.totalorder (!%p241_p2), %s927_s25, 1  ;;  %v319_v3 = vlaneseq (!%p241_p2)  ;;  %v1018_v11 = vmov (!%p241_p2), 1983009808  }
   0x6   : > { %244 = sbr.rel (%p241_p2) target bundleno = 698 (0x2ba), region = 44  ;;  %987 = vset.pattern.permute.xlu0 (!%p241_p2), %v1017_v1  ;;  %726 = vmatprep.mubr.bf16.mxu0 (!%p241_p2), %v1017_v1  ;;  %v305_v2 = vld [vmem:[%s1199_s2] sm:$0xf] (!%p241_p2)  ;;  %v345_v12 = vunpack.c.l.s4 (!%p241_p2), %v1018_v11  ;;  %vm360_vm0 = vcmask (!%p241_p2), 1041408   ;;  %vm361_vm1 = vcmask (!%p241_p2), 1043458   ;;  %vm363_vm3 = vcmask (!%p241_p2), 701444  }
   0x7   : > { %296 = vperm.xlu0 (!%p241_p2), %987, %v291_v0   ;;  %v1092_v5 = vshrl.u32 (!%p241_p2), %v319_v3, 7  ;;  %v317_v13 = vld [vmem:[%s1200_s3] sm:$0x7] (!%p241_p2)  ;;  %vm362_vm2 = vmor (!%p241_p2), %vm361_vm1, %vm360_vm0  ;;  %s1019_s13 = smov (!%p241_p2), 126   ;;  %s1020_s14 = smov (!%p241_p2), 127   ;;  %vm386_vm5 = vcmask (!%p241_p2), 254976  }
   0x8   : > { %v346_v20 = vunpack.c.0.s8 (!%p241_p2), %v345_v12  ;;  %vm364_vm4 = vmor (!%p241_p2), %vm363_vm3, %vm362_vm2  ;;  %s1021_s15 = smov (!%p241_p2), 109   ;;  %s1022_s16 = smov (!%p241_p2), 110   ;;  %v1026_v3 = vmov (!%p241_p2), 0.0   ;;  %vm1028_vm6 = vmmov (!%p241_p2), 0   ;;  %vm418_vm7 = vcmask (!%p241_p2), 257026  }
   0x9   : > { %v321_v9 = vsub.s32 (!%p241_p2), 0, %v1092_v5  ;;  %v325_v10 = vsub.s32 (!%p241_p2), 1, %v1092_v5  ;;  %v329_v14 = vsub.s32 (!%p241_p2), 2, %v1092_v5  ;;  %s1023_s17 = smov (!%p241_p2), 92   ;;  %s1024_s18 = smov (!%p241_p2), 108   ;;  %955 = vmatprep.subr.bf16.mxu1 (!%p241_p2), %v1026_v3  ;;  %961 = vmatprep.mubr.msk.bf16.mxu1 (!%p241_p2), %vm1028_vm6, %v1026_v3  ;;  %vm411_vm8 = vcmask (!%p241_p2), 1043456  }
   0xa   : > { %v1107_v29 = vsub.s32 (!%p241_p2), %v346_v20, %v1092_v5  ;;  %s1025_s19 = smov (!%p241_p2), 91   ;;  %s1027_s23 = smov (!%p241_p2), 90   ;;  %vm474_vm9 = vcmask (!%p241_p2), 900096   ;;  %vm534_vm10 = vcmask (!%p241_p2), 883712   ;;  %vm413_vm11 = vcmask (!%p241_p2), 1039360  }
   0xb   : > { %308 = vperm.xlu0 (!%p241_p2), %987, %v305_v2   ;;  %v322_v18 = vrot.slane (!%p241_p2), %v317_v13, %v321_v9  ;;  %v326_v19 = vrot.slane (!%p241_p2), %v317_v13, %v325_v10  ;;  %v330_v22 = vrot.slane (!%p241_p2), %v317_v13, %v329_v14  ;;  %vm594_vm12 = vcmask (!%p241_p2), 744448  }
   0xc   : > { %vm444_vm13 = vcmask (!%p241_p2), 1031168   ;;  %vm504_vm14 = vcmask (!%p241_p2), 891904   ;;  %vm564_vm15 = vcmask (!%p241_p2), 752640   ;;  %vm624_vm1 = vcmask (!%p241_p2), 736256  }
   0xd   : > { %s1206_s25 = smov (!%p276_p3, %s927_s25), 1  ;;  %vm681_vm2 = vcmask 293888   ;;  %vm819_vm3 = vcmask 699392   ;;  %vm835_vm6 = vcmask 1043608  }
   0xe   : > { %s965_s30 = smul.u32 12, %s1206_s25  ;;  %s934_s8 = sshll.u32 %s1206_s25, 2 }
   0xf   : > { %s289_s11 = scalar_lea.vmem %s1204_s7, %s934_s8 }
  0x10   : > { %s280_s10 = scalar_lea.vmem %s1197_s0, %s965_s30  ;;  %s1134_s22 = scalar_lea.vmem %s1203_s6, %s965_s30 }
  0x11   : > { %v292_v4 = vld [vmem:[%s280_s10] sm:$0xff]  ;;  %v293_v8 = vld [vmem:[%s280_s10 + $0x8] sm:$0xf]  ;;  %818 = vst [vmem:[%s1134_s22] sm:$0xff] %v1026_v3  ;;  %s1029_s30 = smov 19   ;;  %820 = vst.msk [vmem:[%s1134_s22 + $0x8] sm:$0xf] %vm819_vm3, %v1026_v3 }
  0x12   : > { %v300_v6 = vcombine.high %v292_v4, %v292_v4 }
  0x86   : > { %v297_v7 = vpop.permute.xlu0 %296 }
  0x87   : > { %v302_v15 = vmul.f32 %v297_v7, %v292_v4  ;;  %v303_v16 = vmul.f32 %v300_v6, %v297_v7  ;;  %v304_v17 = vmul.f32 %v297_v7, %v293_v8 }
  0x8a   : > { %v309_v21 = vpop.permute.xlu0 %308 }
  0x8b   : > { %v311_v23 = vadd.f32 %v309_v21, %v302_v15  ;;  %v312_v24 = vadd.f32 %v309_v21, %v303_v16  ;;  %v313_v25 = vadd.f32 %v309_v21, %v304_v17 }
  0x8d   : > { %v314_v26 = vmax.f32 %v311_v23, 0.0  ;;  %v315_v27 = vmax.f32 %v312_v24, 0.0  ;;  %v316_v28 = vmax.f32 %v313_v25, 0.0 }
  0x8f   : > { %v334_v30 = vmul.f32 %v322_v18, %v314_v26  ;;  %v335_v31 = vmul.f32 %v326_v19, %v315_v27  ;;  %v336_v32 = vmul.f32 %v330_v22, %v316_v28 }
  0x91   : > { %v339_v33 = vpack.c.bf16 %v336_v32, %v336_v32  ;;  %v935_v34 = vpack.c.bf16 %v335_v31, %v334_v30 }
  0x93   : > { %v350_v35 = vrot.slane %v935_v34, %v1107_v29  ;;  %v357_v36 = vrot.slane %v339_v33, %v1107_v29 }
  0x95   : > { %v358_v37 = vcombine.low %v350_v35, %v357_v36 }
  0x97   : > { %365 = vst.msk [vmem:[#allocation2] sm:$0x3f] %vm364_vm4, %v358_v37  ;;  %vm804_vm4 = vcmask 3072  }
  0x9e   : > { %v420_v38 = vld [vmem:[#allocation2] sm:$0x3f] }
  0x9f   : > { %v388_v39 = vld [vmem:[#allocation2] sm:$0x3f]  ;;  %v429_v40 = vrot.slane %v420_v38, %v1107_v29  ;;  %v422_v62 = vcombine.high %v420_v38, %v420_v38 }
  0xa0   : > { %v404_v41 = vrot.slane %v388_v39, %v1107_v29  ;;  %v480_v42 = vld [vmem:[#allocation2] sm:$0x3f]  ;;  %v390_v55 = vcombine.low %v388_v39, %v388_v39 }
  0xa1   : > { %v450_v43 = vld [vmem:[#allocation2] sm:$0x3f]  ;;  %437 = vrot.lane.b32.xlu0 %v429_v40, %s1019_s13  ;;  %v489_v45 = vrot.slane %v480_v42, %v1107_v29  ;;  %v436_v0 = vrot.slane %v422_v62, %v1107_v29  ;;  %v482_v1 = vcombine.high %v480_v42, %v480_v42 }
  0xa2   : > { %v366_v44 = vld [vmem:[#allocation2] sm:$0x3f]  ;;  %407 = vrot.lane.b32.xlu1 %v404_v41, %s1020_s14  ;;  %v466_v46 = vrot.slane %v450_v43, %v1107_v29  ;;  %v452_v53 = vcombine.low %v450_v43, %v450_v43  ;;  %v397_v60 = vrot.slane %v390_v55, %v1107_v29 }
  0xa3   : > { %936 = vst.sshfl [vmem:[#allocation3] sm:$0xf pattern:$0x76325410] %v366_v44  ;;  %v540_v47 = vld [vmem:[#allocation2] sm:$0x3f]  ;;  %v368_v49 = vcombine.high %v366_v44, %v366_v44  ;;  %v496_v6 = vrot.slane %v482_v1, %v1107_v29 }
  0xa4   : > { %v510_v48 = vld [vmem:[#allocation2] sm:$0x3f]  ;;  %v549_v51 = vrot.slane %v540_v47, %v1107_v29  ;;  %v459_v56 = vrot.slane %v452_v53, %v1107_v29  ;;  %v542_v7 = vcombine.high %v540_v47, %v540_v47 }
  0xa5   : > { %497 = vrot.lane.b32.xlu0 %v489_v45, %s1021_s15  ;;  %v382_v50 = vrot.slane %v368_v49, %v1107_v29  ;;  %v526_v52 = vrot.slane %v510_v48, %v1107_v29  ;;  %v570_v54 = vld [vmem:[#allocation2] sm:$0x3f]  ;;  %v512_v58 = vcombine.low %v510_v48, %v510_v48 }
  0xa6   : > { %469 = vrot.lane.b32.xlu1 %v466_v46, %s1022_s16  ;;  %v586_v57 = vrot.slane %v570_v54, %v1107_v29  ;;  %v572_v61 = vcombine.low %v570_v54, %v570_v54  ;;  %v600_v2 = vld [vmem:[#allocation2] sm:$0x3f]  ;;  %v556_v8 = vrot.slane %v542_v7, %v1107_v29 }
  0xa7   : > { %387 = vst.msk [vmem:[#allocation3 + $0x8] sm:$0x3] %vm386_vm5, %v382_v50  ;;  %v519_v59 = vrot.slane %v512_v58, %v1107_v29  ;;  %v609_v4 = vrot.slane %v600_v2, %v1107_v29  ;;  %v602_v11 = vcombine.high %v600_v2, %v600_v2 }
  0xa8   : > { %v579_v63 = vrot.slane %v572_v61, %v1107_v29 }
  0xa9   : > { %557 = vrot.lane.b32.xlu0 %v549_v51, %s1023_s17  ;;  %v616_v12 = vrot.slane %v602_v11, %v1107_v29  ;;  %v630_v11 = vld [vmem:[%s1201_s4] sm:$0x3] }
  0xaa   : > { %529 = vrot.lane.b32.xlu1 %v526_v52, %s1024_s18 }
  0xad   : > { %467 = vrot.lane.b32.xlu0 %v459_v56, %s1022_s16 }
  0xae   : > { %589 = vrot.lane.b32.xlu1 %v586_v57, %s1025_s19 }
  0xb1   : > { %527 = vrot.lane.b32.xlu0 %v519_v59, %s1024_s18 }
  0xb2   : > { %405 = vrot.lane.b32.xlu1 %v397_v60, %s1020_s14 }
  0xb5   : > { %587 = vrot.lane.b32.xlu0 %v579_v63, %s1025_s19 }
  0xb6   : > { %439 = vrot.lane.b32.xlu1 %v436_v0, %s1019_s13 }
  0xb9   : > { %617 = vrot.lane.b32.xlu0 %v609_v4, %s1027_s23 }
  0xba   : > { %499 = vrot.lane.b32.xlu1 %v496_v6, %s1021_s15 }
  0xbe   : > { %559 = vrot.lane.b32.xlu1 %v556_v8, %s1023_s17 }
  0xc2   : > { %619 = vrot.lane.b32.xlu1 %v616_v12, %s1027_s23 }
 0x113   : > { %v438_v13 = vpop.permute.xlu0 %437 }
 0x114   : > { %v408_v15 = vpop.permute.xlu1 %407  ;;  %v441_v38 = vrot.slane %v438_v13, 4 }
 0x115   : > { %419 = vst.msk [vmem:[#allocation3 + $0x8] sm:$0xc] %vm418_vm7, %v408_v15  ;;  %v410_v28 = vrot.slane %v408_v15, 4 }
 0x117   : > { %v498_v16 = vpop.permute.xlu0 %497 }
 0x118   : > { %v470_v17 = vpop.permute.xlu1 %469  ;;  %v501_v47 = vrot.slane %v498_v16, 4 }
 0x119   : > { %479 = vst.msk [vmem:[#allocation3 + $0x14] sm:$0xc] %vm418_vm7, %v470_v17  ;;  %v472_v22 = vrot.slane %v470_v17, 4 }
 0x11b   : > { %v558_v18 = vpop.permute.xlu0 %557 }
 0x11c   : > { %v530_v19 = vpop.permute.xlu1 %529  ;;  %v561_v53 = vrot.slane %v558_v18, 4 }
 0x11d   : > { %539 = vst.msk [vmem:[#allocation3 + $0x20] sm:$0xc] %vm418_vm7, %v530_v19  ;;  %v532_v29 = vrot.slane %v530_v19, 4 }
 0x11f   : > { %v468_v20 = vpop.permute.xlu0 %467 }
 0x120   : > { %v590_v21 = vpop.permute.xlu1 %589  ;;  %v471_v23 = vrot.slane %v468_v20, 4 }
 0x121   : > { %599 = vst.msk [vmem:[#allocation3 + $0x2c] sm:$0xc] %vm418_vm7, %v590_v21  ;;  %v592_v39 = vrot.slane %v590_v21, 4  ;;  %vm836_vm7 = vcmask 1047556  }
 0x122   : > { %v473_v24 = vsel %vm411_vm8, %v471_v23, %v472_v22 }
 0x123   : > { %v475_v25 = vsel %vm474_vm9, %v468_v20, %v473_v24  ;;  %v528_v26 = vpop.permute.xlu0 %527  ;;  %vm837_vm9 = vmor %vm836_vm7, %vm835_vm6 }
 0x124   : > { %v406_v27 = vpop.permute.xlu1 %405  ;;  %478 = vst [vmem:[#allocation3 + $0xc] sm:$0xcc] %v475_v25  ;;  %v531_v30 = vrot.slane %v528_v26, 4 }
 0x125   : > { %v409_v31 = vrot.slane %v406_v27, 4 }
 0x126   : > { %v533_v32 = vsel %vm411_vm8, %v531_v30, %v532_v29 }
 0x127   : > { %v412_v33 = vsel %vm411_vm8, %v409_v31, %v410_v28  ;;  %v535_v34 = vsel %vm534_vm10, %v528_v26, %v533_v32  ;;  %v588_v36 = vpop.permute.xlu0 %587  ;;  %vm839_vm10 = vcmask 412672  }
 0x128   : > { %v414_v35 = vsel %vm413_vm11, %v406_v27, %v412_v33  ;;  %v440_v37 = vpop.permute.xlu1 %439  ;;  %538 = vst [vmem:[#allocation3 + $0x18] sm:$0xcc] %v535_v34  ;;  %v591_v40 = vrot.slane %v588_v36, 4 }
 0x129   : > { %417 = vst [vmem:[#allocation3] sm:$0xcc] %v414_v35  ;;  %v442_v41 = vrot.slane %v440_v37, 4  ;;  %449 = vst.msk [vmem:[#allocation3 + $0x14] sm:$0x3] %vm386_vm5, %v440_v37 }
 0x12a   : > { %v593_v42 = vsel %vm411_vm8, %v591_v40, %v592_v39 }
 0x12b   : > { %v443_v43 = vsel %vm411_vm8, %v441_v38, %v442_v41  ;;  %v595_v44 = vsel %vm594_vm12, %v588_v36, %v593_v42  ;;  %v618_v55 = vpop.permute.xlu0 %617 }
 0x12c   : > { %v445_v45 = vsel %vm444_vm13, %v438_v13, %v443_v43  ;;  %v500_v46 = vpop.permute.xlu1 %499  ;;  %598 = vst [vmem:[#allocation3 + $0x24] sm:$0xcc] %v595_v44  ;;  %v621_v61 = vrot.slane %v618_v55, 4 }
 0x12d   : > { %448 = vst [vmem:[#allocation3 + $0xc] sm:$0x33] %v445_v45  ;;  %v502_v48 = vrot.slane %v500_v46, 4  ;;  %509 = vst.msk [vmem:[#allocation3 + $0x20] sm:$0x3] %vm386_vm5, %v500_v46 }
 0x12f   : > { %v503_v49 = vsel %vm411_vm8, %v501_v47, %v502_v48 }
 0x130   : > { %v505_v50 = vsel %vm504_vm14, %v498_v16, %v503_v49  ;;  %v560_v51 = vpop.permute.xlu1 %559  ;;  %v998_v52 = vld [vmem:[#allocation3 + $0x8] ss:$12 sps:$4 sm:$0xff]   ;;  %v775_v16 = vld [vmem:[%s1202_s5] sm:$0x7] }
 0x131   : > { %508 = vst [vmem:[#allocation3 + $0x18] sm:$0x33] %v505_v50  ;;  %v562_v54 = vrot.slane %v560_v51, 4  ;;  %569 = vst.msk [vmem:[#allocation3 + $0x2c] sm:$0x3] %vm386_vm5, %v560_v51  ;;  %956 = vmatpush3.bf16.msra.mxu1 %v998_v52  ;;  %v788_v17 = vrot.slane %v775_v16, %v329_v14  ;;  %v780_v19 = vrot.slane %v775_v16, %v321_v9 }
 0x132   : > { %957 = vmatprep.subr.bf16.mxu1 %v1026_v3  ;;  %v784_v22 = vrot.slane %v775_v16, %v325_v10 }
 0x133   : > { %v563_v56 = vsel %vm411_vm8, %v561_v53, %v562_v54 }
 0x134   : > { %v565_v57 = vsel %vm564_vm15, %v558_v18, %v563_v56  ;;  %v620_v58 = vpop.permute.xlu1 %619  ;;  %v999_v59 = vld [vmem:[#allocation3 + $0x4] ss:$12 sps:$4 sm:$0xff]   ;;  %v1001_v60 = vld [vmem:[#allocation3] ss:$12 sps:$4 sm:$0xff]  }
 0x135   : > { %568 = vst [vmem:[#allocation3 + $0x24] sm:$0x33] %v565_v57  ;;  %v622_v62 = vrot.slane %v620_v58, 4  ;;  %629 = vst.msk [vmem:[#allocation3 + $0x38] sm:$0x3] %vm386_vm5, %v620_v58  ;;  %694 = vmatprep.subr.bf16.mxu0 %v999_v59  ;;  %vm816_vm5 = vcmask 11272  }
 0x136   : > { %695 = vmatpush1.bf16.msra.mxu0 %v1001_v60 }
 0x137   : > { %v623_v63 = vsel %vm411_vm8, %v621_v61, %v622_v62 }
 0x138   : > { %v625_v0 = vsel %vm624_vm1, %v618_v55, %v623_v63  ;;  %v1002_v1 = vld [vmem:[#allocation3 + $0x20] ss:$12 sps:$4 sm:$0xff]  }
 0x139   : > { %628 = vst [vmem:[#allocation3 + $0x30] sm:$0x33] %v625_v0  ;;  %958 = vmatpush3.bf16.msra.mxu1 %v1002_v1 }
 0x13a   : > { %959 = vmatprep.subr.bf16.mxu1 %v1026_v3 }
 0x13c   : > { %v1003_v2 = vld [vmem:[#allocation3 + $0x1c] ss:$12 sps:$4 sm:$0xff]   ;;  %v1005_v4 = vld [vmem:[#allocation3 + $0x18] ss:$12 sps:$4 sm:$0xff]  }
 0x13d   : > { %v1006_v6 = vld [vmem:[#allocation3 + $0x38] ss:$0 sps:$4 sm:$0x33]   ;;  %696 = vmatprep.subr.bf16.mxu0 %v1003_v2 }
 0x13e   : > { %697 = vmatpush1.bf16.msra.mxu0 %v1005_v4  ;;  %v692_v7 = vsel %vm360_vm0, %v1006_v6, 0 }
 0x13f   : > { %960 = vmatpush3.bf16.msra.mxu1 %v692_v7 }
 0x140   : > { %v639_v8 = vld [vmem:[#allocation3 + $0x30] sm:$0x33] }
 0x141   : > { %v944_v12 = vcombine.high %v639_v8, %v639_v8  ;;  %v943_v13 = vcombine.low %v639_v8, %v639_v8 }
 0x142   : > { %962 = vmatmul.mubr.msk.bf16.vlgmr.msra.gmra.mrb[0].mxu1 %vm681_vm2, %v630_v11 }
 0x143   : > { %946 = vmatprep.subr.msk.bf16.mxu0 %vm360_vm0, %v944_v12  ;;  %v686_v15 = vsel %vm360_vm0, %v943_v13, 0  ;;  %vm799_vm0 = vcmask 257024  }
 0x144   : > { %699 = vmatpush1.bf16.msra.mxu0 %v686_v15 }
 0x147   : > { %947 = vmatmul.mubr.msk.bf16.vlgmr.msra.gmra.mrb[0].mxu0 %vm681_vm2, %v630_v11 }
 0x215   : > { %v769_v18 = vpop.f32.mrb[0].mxu1 }
 0x216   : > { %v963_v20 = vpop.f32.mrb[1].mxu1  ;;  %v794_v21 = vmul.f32 %v788_v17, %v769_v18 }
 0x217   : > { %v772_v23 = vpop.f32.mrb[2].mxu1 }
 0x218   : > { %v964_v24 = vpop.f32.mrb[3].mxu1  ;;  %v808_v28 = vmul.f32 %v794_v21, %v794_v21  ;;  %v800_v5 = vsel %vm799_vm0, %v794_v21, 0.0 }
 0x21a   : > { %v728_v25 = vpop.f32.mrb[0].mxu0  ;;  %v812_v37 = vsel %vm799_vm0, %v808_v28, 0.0 }
 0x21b   : > { %v792_v26 = vmul.f32 %v780_v19, %v728_v25  ;;  %v730_v27 = vpop.f32.mrb[1].mxu0 }
 0x21c   : > { %v793_v29 = vmul.f32 %v784_v22, %v730_v27  ;;  %v824_v30 = vcombine.low %v728_v25, %v730_v27  ;;  %v732_v31 = vpop.f32.mrb[2].mxu0 }
 0x21d   : > { %v796_v14 = vsel %vm411_vm8, %v792_v26, 0.0  ;;  %v806_v32 = vmul.f32 %v792_v26, %v792_v26  ;;  %v733_v33 = vpop.f32.mrb[3].mxu0 }
 0x21e   : > { %v797_v9 = vsel %vm411_vm8, %v793_v29, 0.0  ;;  %v807_v34 = vmul.f32 %v793_v29, %v793_v29 }
 0x21f   : > { %v798_v10 = vadd.f32 %v797_v9, %v796_v14  ;;  %v809_v35 = vsel %vm411_vm8, %v806_v32, 0.0 }
 0x220   : > { %v810_v36 = vsel %vm411_vm8, %v807_v34, 0.0  ;;  %vm830_vm8 = vcmask 154624  }
 0x221   : > { %v801_v38 = vadd.f32 %v800_v5, %v798_v10  ;;  %v811_v39 = vadd.f32 %v810_v36, %v809_v35 }
 0x223   : > { %802 = vadd.xlane.f32.xlu0 %v801_v38  ;;  %v813_v40 = vadd.f32 %v812_v37, %v811_v39 }
 0x225   : > { %814 = vadd.xlane.f32.xlu1 %v813_v40 }
 0x236   : > { %827 = vrot.lane.b32.xlu1 %v769_v18, %s1029_s30 }
 0x239   : > { %825 = vrot.lane.b32.xlu0 %v824_v30, %s1029_s30 }
 0x2b0   : > { %v803_v41 = vpop.xlane.xlu0 %802 }
 0x2b1   : > { %805 = vst.msk [vmem:[%s289_s11] sm:$0xf] %vm804_vm4, %v803_v41 }
 0x2b2   : > { %v815_v42 = vpop.xlane.xlu1 %814 }
 0x2b3   : > { %817 = vst.msk [vmem:[%s289_s11] sm:$0xf] %vm816_vm5, %v815_v42 }
 0x2b4   : > { %v826_v43 = vpop.permute.xlu0 %825 }
 0x2b5   : > { %v829_v44 = vrot.slane %v826_v43, 4 }
 0x2b6   : > { %v828_v3 = vpop.permute.xlu1 %827 }
 0x2b7   : > { %v831_v45 = vsel %vm830_vm8, %v829_v44, %v826_v43  ;;  %v832_v46 = vsel %vm830_vm8, %v829_v44, %v828_v3 }
 0x2b8   : > { %838 = vst.msk [vmem:[%s1134_s22] sm:$0xff] %vm837_vm9, %v831_v45 }
 0x2b9   : > { %840 = vst.msk [vmem:[%s1134_s22 + $0x8] sm:$0xf] %vm839_vm10, %v832_v46 }
 0x2ba PF: > { %s18_s24 = sadd.s32 1, %s1015_s24  }
 0x2bb   : > { %p15_p4 = scmp.ge.s32.totalorder %s18_s24, 4  }
 0x2bd   :  { %17 = sbr.rel (!%p15_p4) target bundleno = 1 (0x1), region = 86 }

</bundles_post_ra>
